<compile_context>
chip_gen: v7x
topology: tpu7x:2x2x1
jax: 0.10.0
libtpu: 0.0.40
codegen_flags: <defaults>
</compile_context>

<pallas_src>
import functools

import jax
import jax.numpy as jnp
from jax.experimental import pallas as pl
from jax.experimental.pallas import tpu as pltpu


_EPS = 1e-5  # PyTorch InstanceNorm2d default eps


def _conv_stats_kernel(x_ref, w_ref, b_ref, y_ref, sum_ref, sq_ref, *,
                       TH, Wp, Wo, KH, KW):
    # x_ref:   (1, Hp, Cin, Wpad)    full padded sample (stays resident across row tiles)
    # w_ref:   (KH*KW, Cout, Cin)    per-tap weight matrices
    # b_ref:   (1, Cout, 1)          conv bias
    # y_ref:   (1, 1, TH, Cout, Wp)  conv+bias tile (columns >= Wo are junk, cropped later)
    # sum_ref: (1, 1, Cout, 1)       per-tile sum over valid columns
    # sq_ref:  (1, 1, Cout, 1)       per-tile sum of squares over valid columns
    t = pl.program_id(1)
    row0 = t * TH
    cout, cin = w_ref.shape[1], w_ref.shape[2]

    acc = jnp.zeros((TH, cout, Wp), jnp.float32)
    for kh in range(KH):
        # TH haloed input rows for this vertical tap (leading-dim dynamic slice only)
        rows = x_ref[0, pl.ds(row0 + kh, TH), :, :]          # (TH, Cin, Wpad)
        for kw in range(KW):
            slab = rows[:, :, kw:kw + Wp]                    # (TH, Cin, Wp)
            w_tap = jnp.broadcast_to(w_ref[kh * KW + kw], (TH, cout, cin))
            acc = acc + jnp.einsum("toc,tcw->tow", w_tap, slab,
                                   preferred_element_type=jnp.float32)
    acc = acc + b_ref[...]                                   # (1, Cout, 1) broadcast

    # Partial instance-norm statistics over the valid columns (< Wo) of this tile.
    lane = jax.lax.broadcasted_iota(jnp.int32, (1, 1, Wp), 2)
    valid = lane < Wo
    masked = jnp.where(valid, acc, 0.0)
    masked_sq = jnp.where(valid, acc * acc, 0.0)
    sum_ref[0, 0] = jnp.sum(jnp.sum(masked, axis=0), axis=1, keepdims=True)
    sq_ref[0, 0] = jnp.sum(jnp.sum(masked_sq, axis=0), axis=1, keepdims=True)

    y_ref[0, 0] = acc


def _norm_kernel(y_ref, scale_ref, shift_ref, o_ref, *, Wo):
    # y_ref:     (1, 1, TH, Cout, Wp)
    # scale_ref: (1, 1, Cout, 1)
    # shift_ref: (1, 1, Cout, 1)
    # o_ref:     (1, TH, Cout, Wo)
    y = y_ref[0, 0, :, :, :Wo]                               # crop junk columns
    o_ref[0] = (y * scale_ref[0] + shift_ref[0]).astype(o_ref.dtype)


def _pick_row_tile(Ho, Wp):
    """Largest multiple-of-8 divisor of Ho whose tile stays modest; fallback Ho."""
    divs = [th for th in range(8, Ho + 1, 8) if Ho % th == 0]
    if not divs:
        return Ho
    capped = [th for th in divs if th * Wp <= 1024]
    return max(capped) if capped else min(divs)


def upsample_conv_layer(x_nchw, weight, bias, gamma, beta, *, stride=1, upsample=None):
    """Forward pass of UpsampleConvLayer (norm_type='instance', padding=1, reflect)."""
    # TODO(synk): the in-kernel tap contraction assumes stride=1 (every upsample layer in
    # fast-style-transfer uses stride=1); stride>1 would need a strided tap gather.
    assert stride == 1, "Pallas kernel implements the stride=1 configuration"
    N, Cin, H, W = x_nchw.shape
    Cout, _, KH, KW = weight.shape
    pad = 1  # module hard-codes padding=1, padding_mode='reflect'

    # ---- glue (cheap XLA data movement): layout, nearest upsample, reflect pad ----
    x = jnp.transpose(x_nchw, (0, 2, 1, 3)).astype(jnp.float32)       # (N, H, Cin, W)
    if upsample and upsample > 1:
        u = int(upsample)
        x = jnp.broadcast_to(x[:, :, None, :, :, None],
                             (N, H, u, Cin, W, u)).reshape(N, H * u, Cin, W * u)
    Hu, Wu = x.shape[1], x.shape[3]
    xp = jnp.pad(x, ((0, 0), (pad, pad), (0, 0), (pad, pad)), mode="reflect")
    Hp, Wp = Hu + 2 * pad, Wu + 2 * pad
    Ho, Wo = Hp - KH + 1, Wp - KW + 1
    # zero-extend the width so the static in-kernel column shifts stay in bounds
    Wpad = Wp + (KW - 1)
    xp = jnp.pad(xp, ((0, 0), (0, 0), (0, 0), (0, KW - 1)))

    TH = _pick_row_tile(Ho, Wp)
    T = Ho // TH

    w_taps = jnp.transpose(weight, (2, 3, 0, 1)).reshape(KH * KW, Cout, Cin)
    w_taps = w_taps.astype(jnp.float32)
    b_mat = bias.reshape(1, Cout, 1).astype(jnp.float32)

    x_block = Hp * Cin * Wpad * 4
    y_block = TH * Cout * Wp * 4
    vmem1 = int(min(max(8 * (x_block + y_block), 16 << 20), 48 << 20))
    vmem2 = int(min(max(16 * y_block, 16 << 20), 48 << 20))

    # ---- pass 1: conv taps + bias + partial instance-norm stats ----
    conv_kernel = functools.partial(_conv_stats_kernel,
                                    TH=TH, Wp=Wp, Wo=Wo, KH=KH, KW=KW)
    y_wide, psum, psq = pl.pallas_call(
        conv_kernel,
        out_shape=(
            jax.ShapeDtypeStruct((N, T, TH, Cout, Wp), jnp.float32),
            jax.ShapeDtypeStruct((N, T, Cout, 1), jnp.float32),
            jax.ShapeDtypeStruct((N, T, Cout, 1), jnp.float32),
        ),
        grid_spec=pltpu.PrefetchScalarGridSpec(
            num_scalar_prefetch=0,
            grid=(N, T),
            in_specs=[
                pl.BlockSpec((1, Hp, Cin, Wpad), lambda n, t: (n, 0, 0, 0)),
                pl.BlockSpec((KH * KW, Cout, Cin), lambda n, t: (0, 0, 0)),
                pl.BlockSpec((1, Cout, 1), lambda n, t: (0, 0, 0)),
            ],
            out_specs=(
                pl.BlockSpec((1, 1, TH, Cout, Wp), lambda n, t: (n, t, 0, 0, 0)),
                pl.BlockSpec((1, 1, Cout, 1), lambda n, t: (n, t, 0, 0)),
                pl.BlockSpec((1, 1, Cout, 1), lambda n, t: (n, t, 0, 0)),
            ),
        ),
        compiler_params=pltpu.CompilerParams(
            dimension_semantics=("parallel", "parallel"),
            vmem_limit_bytes=vmem1,
        ),
    )(xp, w_taps, b_mat)

    # ---- tiny per-(sample, channel) reduction -> folded affine factors (plain JAX) ----
    cnt = jnp.float32(Ho * Wo)
    s = jnp.sum(psum, axis=(1, 3))                     # (N, Cout)
    ss = jnp.sum(psq, axis=(1, 3))                     # (N, Cout)
    mean = s / cnt
    var = jnp.maximum(ss / cnt - mean * mean, 0.0)     # biased variance (PyTorch IN)
    scale = gamma[None, :].astype(jnp.float32) * jax.lax.rsqrt(var + _EPS)
    shift = beta[None, :].astype(jnp.float32) - mean * scale
    scale4 = scale.reshape(N, 1, Cout, 1)
    shift4 = shift.reshape(N, 1, Cout, 1)

    # ---- pass 2: fused normalize (y*scale + shift) + width crop ----
    norm_kernel = functools.partial(_norm_kernel, Wo=Wo)
    out_nhcw = pl.pallas_call(
        norm_kernel,
        out_shape=jax.ShapeDtypeStruct((N, Ho, Cout, Wo), x_nchw.dtype),
        grid_spec=pltpu.PrefetchScalarGridSpec(
            num_scalar_prefetch=0,
            grid=(N, T),
            in_specs=[
                pl.BlockSpec((1, 1, TH, Cout, Wp), lambda n, t: (n, t, 0, 0, 0)),
                pl.BlockSpec((1, 1, Cout, 1), lambda n, t: (n, 0, 0, 0)),
                pl.BlockSpec((1, 1, Cout, 1), lambda n, t: (n, 0, 0, 0)),
            ],
            out_specs=pl.BlockSpec((1, TH, Cout, Wo), lambda n, t: (n, t, 0, 0)),
        ),
        compiler_params=pltpu.CompilerParams(
            dimension_semantics=("parallel", "parallel"),
            vmem_limit_bytes=vmem2,
        ),
    )(y_wide, scale4, shift4)

    # back to NCHW (one XLA transpose over the final output)
    # TODO(synk): fold this into kernel 2 via an in-kernel (TH,Cout,Wo)->(Cout,TH,Wo)
    # relayout to make the NCHW store fully lane-dense.
    return jnp.transpose(out_nhcw, (0, 2, 1, 3))


def _reference(x_nchw, weight, bias, gamma, beta, *, stride=1, upsample=None):
    """Plain-JAX reference matching PyTorch semantics (sanity check)."""
    x = x_nchw
    if upsample:
        x = jnp.repeat(jnp.repeat(x, upsample, axis=2), upsample, axis=3)
    xp = jnp.pad(x, ((0, 0), (0, 0), (1, 1), (1, 1)), mode="reflect")
    y = jax.lax.conv_general_dilated(
        xp, weight, window_strides=(stride, stride), padding="VALID",
        dimension_numbers=("NCHW", "OIHW", "NCHW"),
        precision=jax.lax.Precision.HIGHEST)
    y = y + bias[None, :, None, None]
    mean = jnp.mean(y, axis=(2, 3), keepdims=True)
    var = jnp.mean((y - mean) ** 2, axis=(2, 3), keepdims=True)
    yn = (y - mean) / jnp.sqrt(var + _EPS)
    return yn * gamma[None, :, None, None] + beta[None, :, None, None]


if __name__ == "__main__":
    # UpsampleConvLayer(4, 8, kernel_size=3, stride=1, upsample=2)
    N, Cin, H, W = 2, 4, 16, 16
    Cout, K = 8, 3
    stride, upsample = 1, 2

    key = jax.random.PRNGKey(0)
    k_x, k_w, k_b, k_g, k_be = jax.random.split(key, 5)

    x = jax.random.normal(k_x, (N, Cin, H, W), dtype=jnp.float32)
    weight = jax.random.normal(k_w, (Cout, Cin, K, K), dtype=jnp.float32) * 0.1
    bias = jax.random.normal(k_b, (Cout,), dtype=jnp.float32) * 0.1
    gamma = 1.0 + 0.1 * jax.random.normal(k_g, (Cout,), dtype=jnp.float32)
    beta = 0.1 * jax.random.normal(k_be, (Cout,), dtype=jnp.float32)

    out = upsample_conv_layer(x, weight, bias, gamma, beta,
                              stride=stride, upsample=upsample)
    out = jax.block_until_ready(out)

    ref = _reference(x, weight, bias, gamma, beta, stride=stride, upsample=upsample)
    assert out.shape == (N, Cout, H * upsample, W * upsample), out.shape
    # default-precision MXU (bf16 passes, f32 accumulate) => looser tolerance than HIGHEST
    err = float(jnp.max(jnp.abs(out - ref)))
    assert jnp.allclose(out, ref, atol=3e-2, rtol=3e-2), err

    print("KERNEL_OK")
</pallas_src>

<mosaic_0001>
module attributes {stable_mosaic.version = 11 : i64} {
  func.func @_conv_stats_kernel(%arg0: i32, %arg1: i32, %arg2: memref<1x34x4x36xf32, #tpu.memory_space<vmem>>, %arg3: memref<9x8x4xf32, #tpu.memory_space<vmem>>, %arg4: memref<1x8x1xf32, #tpu.memory_space<vmem>>, %arg5: memref<1x1x16x8x34xf32, #tpu.memory_space<vmem>>, %arg6: memref<1x1x8x1xf32, #tpu.memory_space<vmem>>, %arg7: memref<1x1x8x1xf32, #tpu.memory_space<vmem>>) attributes {dimension_semantics = [#tpu.dimension_semantics<parallel>, #tpu.dimension_semantics<parallel>], iteration_bounds = array<i64: 2, 2>, scalar_prefetch = 0 : i64, scratch_operands = 0 : i64, tpu.core_type = #tpu.core_type<tc>, window_params = [{transform_indices = @transform_0, window_bounds = array<i64: 1, 34, 4, 36>}, {pipeline_mode = #tpu.pipeline_mode<synchronous>, transform_indices = @transform_1, window_bounds = array<i64: 9, 8, 4>}, {pipeline_mode = #tpu.pipeline_mode<synchronous>, transform_indices = @transform_2, window_bounds = array<i64: 1, 8, 1>}, {transform_indices = @transform_3, window_bounds = array<i64: 1, 1, 16, 8, 34>}, {transform_indices = @transform_4, window_bounds = array<i64: 1, 1, 8, 1>}, {transform_indices = @transform_5, window_bounds = array<i64: 1, 1, 8, 1>}]} {
    %c16_i32 = arith.constant 16 : i32
    %0 = arith.muli %arg1, %c16_i32 : i32
    %cst = arith.constant 0.000000e+00 : f32
    %1 = vector.broadcast %cst : f32 to vector<16x8x34xf32>
    %c0_i32 = arith.constant 0 : i32
    %2 = arith.addi %0, %c0_i32 : i32
    %c0 = arith.constant 0 : index
    %3 = arith.index_cast %2 : i32 to index
    %c0_0 = arith.constant 0 : index
    %c0_1 = arith.constant 0 : index
    %4 = vector.load %arg2[%c0, %3, %c0_0, %c0_1] : memref<1x34x4x36xf32, #tpu.memory_space<vmem>>, vector<1x16x4x36xf32>
    %5 = vector.shape_cast %4 : vector<1x16x4x36xf32> to vector<16x4x36xf32>
    %6 = vector.extract_strided_slice %5 {offsets = [0, 0, 0], sizes = [16, 4, 34], strides = [1, 1, 1]} : vector<16x4x36xf32> to vector<16x4x34xf32>
    %c0_2 = arith.constant 0 : index
    %c0_3 = arith.constant 0 : index
    %c0_4 = arith.constant 0 : index
    %7 = vector.load %arg3[%c0_2, %c0_3, %c0_4] : memref<9x8x4xf32, #tpu.memory_space<vmem>>, vector<1x8x4xf32>
    %8 = vector.shape_cast %7 : vector<1x8x4xf32> to vector<8x4xf32>
    %9 = vector.shape_cast %8 : vector<8x4xf32> to vector<1x8x4xf32>
    %10 = vector.broadcast %9 : vector<1x8x4xf32> to vector<16x8x4xf32>
    "tpu.trace_start"() <{level = 10 : i32, message = "toc,tcw->tow"}> : () -> ()
    %cst_5 = arith.constant dense<0.000000e+00> : vector<16x8x34xf32>
    %11 = tpu.matmul %10, %6, %cst_5 {dimension_numbers = #tpu.dot_dimension_numbers<[2], [1], [1], [2], [0, 0, 0, 1, 1, 2], [0], [0]>} : vector<16x8x4xf32>, vector<16x4x34xf32>, vector<16x8x34xf32> -> vector<16x8x34xf32>
    "tpu.trace_stop"() : () -> ()
    %12 = arith.addf %1, %11 : vector<16x8x34xf32>
    %13 = vector.extract_strided_slice %5 {offsets = [0, 0, 1], sizes = [16, 4, 34], strides = [1, 1, 1]} : vector<16x4x36xf32> to vector<16x4x34xf32>
    %c1 = arith.constant 1 : index
    %c0_6 = arith.constant 0 : index
    %c0_7 = arith.constant 0 : index
    %14 = vector.load %arg3[%c1, %c0_6, %c0_7] : memref<9x8x4xf32, #tpu.memory_space<vmem>>, vector<1x8x4xf32>
    %15 = vector.shape_cast %14 : vector<1x8x4xf32> to vector<8x4xf32>
    %16 = vector.shape_cast %15 : vector<8x4xf32> to vector<1x8x4xf32>
    %17 = vector.broadcast %16 : vector<1x8x4xf32> to vector<16x8x4xf32>
    "tpu.trace_start"() <{level = 10 : i32, message = "toc,tcw->tow"}> : () -> ()
    %cst_8 = arith.constant dense<0.000000e+00> : vector<16x8x34xf32>
    %18 = tpu.matmul %17, %13, %cst_8 {dimension_numbers = #tpu.dot_dimension_numbers<[2], [1], [1], [2], [0, 0, 0, 1, 1, 2], [0], [0]>} : vector<16x8x4xf32>, vector<16x4x34xf32>, vector<16x8x34xf32> -> vector<16x8x34xf32>
    "tpu.trace_stop"() : () -> ()
    %19 = arith.addf %12, %18 : vector<16x8x34xf32>
    %20 = vector.extract_strided_slice %5 {offsets = [0, 0, 2], sizes = [16, 4, 34], strides = [1, 1, 1]} : vector<16x4x36xf32> to vector<16x4x34xf32>
    %c2 = arith.constant 2 : index
    %c0_9 = arith.constant 0 : index
    %c0_10 = arith.constant 0 : index
    %21 = vector.load %arg3[%c2, %c0_9, %c0_10] : memref<9x8x4xf32, #tpu.memory_space<vmem>>, vector<1x8x4xf32>
    %22 = vector.shape_cast %21 : vector<1x8x4xf32> to vector<8x4xf32>
    %23 = vector.shape_cast %22 : vector<8x4xf32> to vector<1x8x4xf32>
    %24 = vector.broadcast %23 : vector<1x8x4xf32> to vector<16x8x4xf32>
    "tpu.trace_start"() <{level = 10 : i32, message = "toc,tcw->tow"}> : () -> ()
    %cst_11 = arith.constant dense<0.000000e+00> : vector<16x8x34xf32>
    %25 = tpu.matmul %24, %20, %cst_11 {dimension_numbers = #tpu.dot_dimension_numbers<[2], [1], [1], [2], [0, 0, 0, 1, 1, 2], [0], [0]>} : vector<16x8x4xf32>, vector<16x4x34xf32>, vector<16x8x34xf32> -> vector<16x8x34xf32>
    "tpu.trace_stop"() : () -> ()
    %26 = arith.addf %19, %25 : vector<16x8x34xf32>
    %c1_i32 = arith.constant 1 : i32
    %27 = arith.addi %0, %c1_i32 : i32
    %c0_12 = arith.constant 0 : index
    %28 = arith.index_cast %27 : i32 to index
    %c0_13 = arith.constant 0 : index
    %c0_14 = arith.constant 0 : index
    %29 = vector.load %arg2[%c0_12, %28, %c0_13, %c0_14] : memref<1x34x4x36xf32, #tpu.memory_space<vmem>>, vector<1x16x4x36xf32>
    %30 = vector.shape_cast %29 : vector<1x16x4x36xf32> to vector<16x4x36xf32>
    %31 = vector.extract_strided_slice %30 {offsets = [0, 0, 0], sizes = [16, 4, 34], strides = [1, 1, 1]} : vector<16x4x36xf32> to vector<16x4x34xf32>
    %c3 = arith.constant 3 : index
    %c0_15 = arith.constant 0 : index
    %c0_16 = arith.constant 0 : index
    %32 = vector.load %arg3[%c3, %c0_15, %c0_16] : memref<9x8x4xf32, #tpu.memory_space<vmem>>, vector<1x8x4xf32>
    %33 = vector.shape_cast %32 : vector<1x8x4xf32> to vector<8x4xf32>
    %34 = vector.shape_cast %33 : vector<8x4xf32> to vector<1x8x4xf32>
    %35 = vector.broadcast %34 : vector<1x8x4xf32> to vector<16x8x4xf32>
    "tpu.trace_start"() <{level = 10 : i32, message = "toc,tcw->tow"}> : () -> ()
    %cst_17 = arith.constant dense<0.000000e+00> : vector<16x8x34xf32>
    %36 = tpu.matmul %35, %31, %cst_17 {dimension_numbers = #tpu.dot_dimension_numbers<[2], [1], [1], [2], [0, 0, 0, 1, 1, 2], [0], [0]>} : vector<16x8x4xf32>, vector<16x4x34xf32>, vector<16x8x34xf32> -> vector<16x8x34xf32>
    "tpu.trace_stop"() : () -> ()
    %37 = arith.addf %26, %36 : vector<16x8x34xf32>
    %38 = vector.extract_strided_slice %30 {offsets = [0, 0, 1], sizes = [16, 4, 34], strides = [1, 1, 1]} : vector<16x4x36xf32> to vector<16x4x34xf32>
    %c4 = arith.constant 4 : index
    %c0_18 = arith.constant 0 : index
    %c0_19 = arith.constant 0 : index
    %39 = vector.load %arg3[%c4, %c0_18, %c0_19] : memref<9x8x4xf32, #tpu.memory_space<vmem>>, vector<1x8x4xf32>
    %40 = vector.shape_cast %39 : vector<1x8x4xf32> to vector<8x4xf32>
    %41 = vector.shape_cast %40 : vector<8x4xf32> to vector<1x8x4xf32>
    %42 = vector.broadcast %41 : vector<1x8x4xf32> to vector<16x8x4xf32>
    "tpu.trace_start"() <{level = 10 : i32, message = "toc,tcw->tow"}> : () -> ()
    %cst_20 = arith.constant dense<0.000000e+00> : vector<16x8x34xf32>
    %43 = tpu.matmul %42, %38, %cst_20 {dimension_numbers = #tpu.dot_dimension_numbers<[2], [1], [1], [2], [0, 0, 0, 1, 1, 2], [0], [0]>} : vector<16x8x4xf32>, vector<16x4x34xf32>, vector<16x8x34xf32> -> vector<16x8x34xf32>
    "tpu.trace_stop"() : () -> ()
    %44 = arith.addf %37, %43 : vector<16x8x34xf32>
    %45 = vector.extract_strided_slice %30 {offsets = [0, 0, 2], sizes = [16, 4, 34], strides = [1, 1, 1]} : vector<16x4x36xf32> to vector<16x4x34xf32>
    %c5 = arith.constant 5 : index
    %c0_21 = arith.constant 0 : index
    %c0_22 = arith.constant 0 : index
    %46 = vector.load %arg3[%c5, %c0_21, %c0_22] : memref<9x8x4xf32, #tpu.memory_space<vmem>>, vector<1x8x4xf32>
    %47 = vector.shape_cast %46 : vector<1x8x4xf32> to vector<8x4xf32>
    %48 = vector.shape_cast %47 : vector<8x4xf32> to vector<1x8x4xf32>
    %49 = vector.broadcast %48 : vector<1x8x4xf32> to vector<16x8x4xf32>
    "tpu.trace_start"() <{level = 10 : i32, message = "toc,tcw->tow"}> : () -> ()
    %cst_23 = arith.constant dense<0.000000e+00> : vector<16x8x34xf32>
    %50 = tpu.matmul %49, %45, %cst_23 {dimension_numbers = #tpu.dot_dimension_numbers<[2], [1], [1], [2], [0, 0, 0, 1, 1, 2], [0], [0]>} : vector<16x8x4xf32>, vector<16x4x34xf32>, vector<16x8x34xf32> -> vector<16x8x34xf32>
    "tpu.trace_stop"() : () -> ()
    %51 = arith.addf %44, %50 : vector<16x8x34xf32>
    %c2_i32 = arith.constant 2 : i32
    %52 = arith.addi %0, %c2_i32 : i32
    %c0_24 = arith.constant 0 : index
    %53 = arith.index_cast %52 : i32 to index
    %c0_25 = arith.constant 0 : index
    %c0_26 = arith.constant 0 : index
    %54 = vector.load %arg2[%c0_24, %53, %c0_25, %c0_26] : memref<1x34x4x36xf32, #tpu.memory_space<vmem>>, vector<1x16x4x36xf32>
    %55 = vector.shape_cast %54 : vector<1x16x4x36xf32> to vector<16x4x36xf32>
    %56 = vector.extract_strided_slice %55 {offsets = [0, 0, 0], sizes = [16, 4, 34], strides = [1, 1, 1]} : vector<16x4x36xf32> to vector<16x4x34xf32>
    %c6 = arith.constant 6 : index
    %c0_27 = arith.constant 0 : index
    %c0_28 = arith.constant 0 : index
    %57 = vector.load %arg3[%c6, %c0_27, %c0_28] : memref<9x8x4xf32, #tpu.memory_space<vmem>>, vector<1x8x4xf32>
    %58 = vector.shape_cast %57 : vector<1x8x4xf32> to vector<8x4xf32>
    %59 = vector.shape_cast %58 : vector<8x4xf32> to vector<1x8x4xf32>
    %60 = vector.broadcast %59 : vector<1x8x4xf32> to vector<16x8x4xf32>
    "tpu.trace_start"() <{level = 10 : i32, message = "toc,tcw->tow"}> : () -> ()
    %cst_29 = arith.constant dense<0.000000e+00> : vector<16x8x34xf32>
    %61 = tpu.matmul %60, %56, %cst_29 {dimension_numbers = #tpu.dot_dimension_numbers<[2], [1], [1], [2], [0, 0, 0, 1, 1, 2], [0], [0]>} : vector<16x8x4xf32>, vector<16x4x34xf32>, vector<16x8x34xf32> -> vector<16x8x34xf32>
    "tpu.trace_stop"() : () -> ()
    %62 = arith.addf %51, %61 : vector<16x8x34xf32>
    %63 = vector.extract_strided_slice %55 {offsets = [0, 0, 1], sizes = [16, 4, 34], strides = [1, 1, 1]} : vector<16x4x36xf32> to vector<16x4x34xf32>
    %c7 = arith.constant 7 : index
    %c0_30 = arith.constant 0 : index
    %c0_31 = arith.constant 0 : index
    %64 = vector.load %arg3[%c7, %c0_30, %c0_31] : memref<9x8x4xf32, #tpu.memory_space<vmem>>, vector<1x8x4xf32>
    %65 = vector.shape_cast %64 : vector<1x8x4xf32> to vector<8x4xf32>
    %66 = vector.shape_cast %65 : vector<8x4xf32> to vector<1x8x4xf32>
    %67 = vector.broadcast %66 : vector<1x8x4xf32> to vector<16x8x4xf32>
    "tpu.trace_start"() <{level = 10 : i32, message = "toc,tcw->tow"}> : () -> ()
    %cst_32 = arith.constant dense<0.000000e+00> : vector<16x8x34xf32>
    %68 = tpu.matmul %67, %63, %cst_32 {dimension_numbers = #tpu.dot_dimension_numbers<[2], [1], [1], [2], [0, 0, 0, 1, 1, 2], [0], [0]>} : vector<16x8x4xf32>, vector<16x4x34xf32>, vector<16x8x34xf32> -> vector<16x8x34xf32>
    "tpu.trace_stop"() : () -> ()
    %69 = arith.addf %62, %68 : vector<16x8x34xf32>
    %70 = vector.extract_strided_slice %55 {offsets = [0, 0, 2], sizes = [16, 4, 34], strides = [1, 1, 1]} : vector<16x4x36xf32> to vector<16x4x34xf32>
    %c8 = arith.constant 8 : index
    %c0_33 = arith.constant 0 : index
    %c0_34 = arith.constant 0 : index
    %71 = vector.load %arg3[%c8, %c0_33, %c0_34] : memref<9x8x4xf32, #tpu.memory_space<vmem>>, vector<1x8x4xf32>
    %72 = vector.shape_cast %71 : vector<1x8x4xf32> to vector<8x4xf32>
    %73 = vector.shape_cast %72 : vector<8x4xf32> to vector<1x8x4xf32>
    %74 = vector.broadcast %73 : vector<1x8x4xf32> to vector<16x8x4xf32>
    "tpu.trace_start"() <{level = 10 : i32, message = "toc,tcw->tow"}> : () -> ()
    %cst_35 = arith.constant dense<0.000000e+00> : vector<16x8x34xf32>
    %75 = tpu.matmul %74, %70, %cst_35 {dimension_numbers = #tpu.dot_dimension_numbers<[2], [1], [1], [2], [0, 0, 0, 1, 1, 2], [0], [0]>} : vector<16x8x4xf32>, vector<16x4x34xf32>, vector<16x8x34xf32> -> vector<16x8x34xf32>
    "tpu.trace_stop"() : () -> ()
    %76 = arith.addf %69, %75 : vector<16x8x34xf32>
    %c0_36 = arith.constant 0 : index
    %c0_37 = arith.constant 0 : index
    %c0_38 = arith.constant 0 : index
    %77 = vector.load %arg4[%c0_36, %c0_37, %c0_38] : memref<1x8x1xf32, #tpu.memory_space<vmem>>, vector<1x8x1xf32>
    %78 = vector.broadcast %77 : vector<1x8x1xf32> to vector<16x8x34xf32>
    %79 = arith.addf %76, %78 : vector<16x8x34xf32>
    %80 = tpu.iota {dimensions = array<i32: 2>} : vector<1x1x34xi32>
    %c32_i32 = arith.constant 32 : i32
    %81 = vector.broadcast %c32_i32 : i32 to vector<1x1x34xi32>
    %82 = arith.cmpi slt, %80, %81 : vector<1x1x34xi32>
    %cst_39 = arith.constant 0.000000e+00 : f32
    %83 = vector.shape_cast %82 : vector<1x1x34xi1> to vector<1x1x34xi1>
    %84 = vector.broadcast %83 : vector<1x1x34xi1> to vector<16x8x34xi1>
    %85 = vector.broadcast %cst_39 : f32 to vector<16x8x34xf32>
    %86 = arith.select %84, %79, %85 : vector<16x8x34xi1>, vector<16x8x34xf32>
    %87 = arith.mulf %79, %79 : vector<16x8x34xf32>
    %cst_40 = arith.constant 0.000000e+00 : f32
    %88 = vector.shape_cast %82 : vector<1x1x34xi1> to vector<1x1x34xi1>
    %89 = vector.broadcast %88 : vector<1x1x34xi1> to vector<16x8x34xi1>
    %90 = vector.broadcast %cst_40 : f32 to vector<16x8x34xf32>
    %91 = arith.select %89, %87, %90 : vector<16x8x34xi1>, vector<16x8x34xf32>
    %cst_41 = arith.constant dense<0.000000e+00> : vector<8x34xf32>
    %92 = vector.multi_reduction <add>, %86, %cst_41 [0] : vector<16x8x34xf32> to vector<8x34xf32>
    %cst_42 = arith.constant dense<0.000000e+00> : vector<8xf32>
    %93 = vector.multi_reduction <add>, %92, %cst_42 [1] : vector<8x34xf32> to vector<8xf32>
    %94 = vector.shape_cast %93 : vector<8xf32> to vector<8x1xf32>
    %c0_43 = arith.constant 0 : index
    %c0_44 = arith.constant 0 : index
    %c0_45 = arith.constant 0 : index
    %c0_46 = arith.constant 0 : index
    %95 = vector.load %arg6[%c0_43, %c0_44, %c0_45, %c0_46] : memref<1x1x8x1xf32, #tpu.memory_space<vmem>>, vector<1x1x8x1xf32>
    %96 = vector.shape_cast %95 : vector<1x1x8x1xf32> to vector<8x1xf32>
    %97 = vector.shape_cast %94 : vector<8x1xf32> to vector<1x1x8x1xf32>
    tpu.vector_store %arg6[%c0_43, %c0_44, %c0_45, %c0_46], %97 {strides = array<i32>} : memref<1x1x8x1xf32, #tpu.memory_space<vmem>>, vector<1x1x8x1xf32>,
    %cst_47 = arith.constant dense<0.000000e+00> : vector<8x34xf32>
    %98 = vector.multi_reduction <add>, %91, %cst_47 [0] : vector<16x8x34xf32> to vector<8x34xf32>
    %cst_48 = arith.constant dense<0.000000e+00> : vector<8xf32>
    %99 = vector.multi_reduction <add>, %98, %cst_48 [1] : vector<8x34xf32> to vector<8xf32>
    %100 = vector.shape_cast %99 : vector<8xf32> to vector<8x1xf32>
    %c0_49 = arith.constant 0 : index
    %c0_50 = arith.constant 0 : index
    %c0_51 = arith.constant 0 : index
    %c0_52 = arith.constant 0 : index
    %101 = vector.load %arg7[%c0_49, %c0_50, %c0_51, %c0_52] : memref<1x1x8x1xf32, #tpu.memory_space<vmem>>, vector<1x1x8x1xf32>
    %102 = vector.shape_cast %101 : vector<1x1x8x1xf32> to vector<8x1xf32>
    %103 = vector.shape_cast %100 : vector<8x1xf32> to vector<1x1x8x1xf32>
    tpu.vector_store %arg7[%c0_49, %c0_50, %c0_51, %c0_52], %103 {strides = array<i32>} : memref<1x1x8x1xf32, #tpu.memory_space<vmem>>, vector<1x1x8x1xf32>,
    %c0_53 = arith.constant 0 : index
    %c0_54 = arith.constant 0 : index
    %c0_55 = arith.constant 0 : index
    %c0_56 = arith.constant 0 : index
    %c0_57 = arith.constant 0 : index
    %104 = vector.load %arg5[%c0_53, %c0_54, %c0_55, %c0_56, %c0_57] : memref<1x1x16x8x34xf32, #tpu.memory_space<vmem>>, vector<1x1x16x8x34xf32>
    %105 = vector.shape_cast %104 : vector<1x1x16x8x34xf32> to vector<16x8x34xf32>
    %106 = vector.shape_cast %79 : vector<16x8x34xf32> to vector<1x1x16x8x34xf32>
    tpu.vector_store %arg5[%c0_53, %c0_54, %c0_55, %c0_56, %c0_57], %106 {strides = array<i32>} : memref<1x1x16x8x34xf32, #tpu.memory_space<vmem>>, vector<1x1x16x8x34xf32>,
    return
  }
  func.func @transform_0(%arg0: i32, %arg1: i32) -> (i32, i32, i32, i32) {
    %c0_i32 = arith.constant 0 : i32
    %c0_i32_0 = arith.constant 0 : i32
    %c0_i32_1 = arith.constant 0 : i32
    %c0_i32_2 = arith.constant 0 : i32
    return %arg0, %c0_i32, %c0_i32_0, %c0_i32_1 : i32, i32, i32, i32
  }
  func.func @transform_1(%arg0: i32, %arg1: i32) -> (i32, i32, i32) {
    %c0_i32 = arith.constant 0 : i32
    %c0_i32_0 = arith.constant 0 : i32
    %c0_i32_1 = arith.constant 0 : i32
    %c0_i32_2 = arith.constant 0 : i32
    return %c0_i32, %c0_i32_0, %c0_i32_1 : i32, i32, i32
  }
  func.func @transform_2(%arg0: i32, %arg1: i32) -> (i32, i32, i32) {
    %c0_i32 = arith.constant 0 : i32
    %c0_i32_0 = arith.constant 0 : i32
    %c0_i32_1 = arith.constant 0 : i32
    %c0_i32_2 = arith.constant 0 : i32
    return %c0_i32, %c0_i32_0, %c0_i32_1 : i32, i32, i32
  }
  func.func @transform_3(%arg0: i32, %arg1: i32) -> (i32, i32, i32, i32, i32) {
    %c0_i32 = arith.constant 0 : i32
    %c0_i32_0 = arith.constant 0 : i32
    %c0_i32_1 = arith.constant 0 : i32
    %c0_i32_2 = arith.constant 0 : i32
    return %arg0, %arg1, %c0_i32, %c0_i32_0, %c0_i32_1 : i32, i32, i32, i32, i32
  }
  func.func @transform_4(%arg0: i32, %arg1: i32) -> (i32, i32, i32, i32) {
    %c0_i32 = arith.constant 0 : i32
    %c0_i32_0 = arith.constant 0 : i32
    %c0_i32_1 = arith.constant 0 : i32
    return %arg0, %arg1, %c0_i32, %c0_i32_0 : i32, i32, i32, i32
  }
  func.func @transform_5(%arg0: i32, %arg1: i32) -> (i32, i32, i32, i32) {
    %c0_i32 = arith.constant 0 : i32
    %c0_i32_0 = arith.constant 0 : i32
    %c0_i32_1 = arith.constant 0 : i32
    return %arg0, %arg1, %c0_i32, %c0_i32_0 : i32, i32, i32, i32
  }
}

</mosaic_0001>

<bundles_post_ra>
// kernel: tpu_custom_call.1
= control target key start
LH: loop header
LB: loop body
LE: loop exit
PB: predicated region body
PF: predicated region fallthrough
CT: control target
= control target key end

     0   :  { %s15020_s0 = inlined_call_operand.hbm [shape: f32[2,34,4,36], index: 0, kind: input, shape index: {}]   ;;  %s15021_s1 = inlined_call_operand.vmem [shape: f32[9,8,4], index: 1, kind: input, shape index: {}]   ;;  %s15022_s2 = inlined_call_operand.vmem [shape: f32[1,8,1], index: 2, kind: input, shape index: {}]   ;;  %s15023_s3 = inlined_call_operand.hbm [shape: f32[2,2,16,8,34], index: 3, kind: output, shape index: {0}]   ;;  %s15024_s4 = inlined_call_operand.vmem [shape: f32[2,2,8,1], index: 4, kind: output, shape index: {1}]   ;;  %s15025_s5 = inlined_call_operand.vmem [shape: f32[2,2,8,1], index: 5, kind: output, shape index: {2}]  }
   0x1   :  { %15031 = sst [smem:[#allocation12_spill]] %s15020_s0 }
   0x2   :  { %11 = vsyncpa [#allocation3], 0 }
   0x3   :  { %13 = vsyncpa [#allocation3 + $0x1], 0 }
   0x4   :  { %14 = vsyncpa [#allocation4], 0 }
   0x5   :  { %16 = vsyncpa [#allocation4 + $0x1], 0  ;;  %s13163_s18 = smov 0   ;;  %s13165_s19 = smov 0  }
   0x6   :  { %s13167_s20 = smov 0   ;;  %s13169_s21 = smov 0  }
   0x7   :  { %s13171_s22 = smov 0   ;;  %s13173_s23 = smov 0  }
   0x8   :  { %s13175_s24 = smov 0   ;;  %s13177_s25 = smov 0  }
   0x9   :  { %s13179_s26 = smov 0   ;;  %s13181_s27 = smov 0  }
   0xa   :  { %s13183_s28 = smov 0  }
   0xb LB: > { %15032 = sst [smem:[#allocation8_spill]] %s13112_s26  ;;  %s11491_s29 = sadd.s32 4294967295, %s13120_s28   ;;  %s13120_s28 = sphi %s13183_s28, %s22_s28   ;;  %s13116_s27 = sphi %s13181_s27, %s15048_s27   ;;  %s13112_s26 = sphi %s13179_s26, %s15047_s26   ;;  %s13108_s25 = sphi %s13177_s25, %s15046_s25   ;;  %s13104_s24 = sphi %s13175_s24, %s15045_s24   ;;  %s13100_s23 = sphi %s13173_s23, %s15054_s23   ;;  %s13096_s22 = sphi %s13171_s22, %s15053_s22   ;;  %s13092_s21 = sphi %s13169_s21, %s15052_s21   ;;  %s13088_s20 = sphi %s13167_s20, %s15051_s20   ;;  %s13084_s19 = sphi %s13165_s19, %s15050_s19   ;;  %s13080_s18 = sphi %s13163_s18, %s15049_s18  }
   0xc   : > { %15033 = sst [smem:[#allocation9_spill]] %s13116_s27  ;;  %s11492_s30 = sadd.s32 4294967294, %s13120_s28  }
   0xd   : > { %s31_s6 = sadd.s32 1, %s13112_s26  ;;  %s34_s7 = sadd.s32 1, %s13116_s27 }
   0xe   : > { %p32_p0 = scmp.ge.s32.totalorder %s31_s6, 2  ;;  %s41_s8 = sadd.s32 1, %s13100_s23 }
   0xf   : > { %p48_p1 = scmp.ne.s32.totalorder %s13100_s23, %s13096_s22  ;;  %p49_p2 = scmp.eq.s32.totalorder %s13120_s28, 0 }
  0x10   : > { %s15056_s6 = smov (%p32_p0, %s31_s6), 0  ;;  %s15058_s7 = smov (!%p32_p0, %s34_s7), %s13116_s27 }
  0x11   : > { %15034 = sst [smem:[#allocation10_spill]] %s15056_s6  ;;  %p13227_p3 = por %p49_p2, %p48_p1 }
  0x12   : > { %p54_p4 = scmp.ne.s32.totalorder %s13096_s22, %s13092_s21  ;;  %p36_p5 = scmp.ge.s32.totalorder %s15058_s7, 2 }
  0x13   : > { %p55_p6 = scmp.eq.s32.totalorder %s11491_s29, 0  ;;  %s107_s10 = ssub.s32 %s13112_s26, %s15056_s6 }
  0x14   : > { %s111_s11 = sadd.s32 1, %s13088_s20  ;;  %s15060_s7 = smov (%p36_p5, %s15058_s7), 0 }
  0x15   : > { %15036 = sst [smem:[#allocation11_spill]] %s15060_s7  ;;  %p13237_p7 = por %p55_p6, %p54_p4 }
  0x16   : > { %p121_p8 = scmp.ne.s32.totalorder %s13088_s20, %s13084_s19  ;;  %s38_s13 = ssub.s32 %s13116_s27, %s15060_s7 }
  0x17   : > { %p122_p9 = scmp.eq.s32.totalorder %s11491_s29, 3  ;;  %p39_p10 = scmp.eq.s32.totalorder %s38_s13, 0 }
  0x18   : > { %s108_s14 = sor.u32 %s107_s10, %s38_s13  ;;  %p127_p13 = scmp.ne.s32.totalorder %s13084_s19, %s13080_s18 }
  0x19   : > { %p109_p11 = scmp.eq.s32.totalorder %s108_s14, 0  ;;  %p13245_p12 = por %p122_p9, %p121_p8 }
  0x1a   : > { %s13250_s16 = scalar_select %p39_p10, %s13100_s23, %s41_s8  }
  0x1b   : > { %s15038_s15 = scalar_select %p13245_p12, 1, 0 }
  0x1c   : > { %s13253_s17 = scalar_select %p109_p11, %s13088_s20, %s111_s11  }
  0x1d   : > { %p128_p0 = scmp.eq.s32.totalorder %s11492_s30, 3  ;;  %p12868_p1 = scmp.lt.s32.totalorder %s13120_s28, 4 }
  0x1e   : > { %s210_s29 = sand.u32 1, %s13100_s23   ;;  %s12854_s10 = smul.u32 2176, %s13116_s27 }
  0x1f   : > { %p13258_p2 = por %p128_p0, %p127_p13  ;;  %s12853_s7 = smul.u32 136, %s210_s29 }
  0x20   : > { %p13266_p4 = pnand %p12868_p1, %p13227_p3  ;;  %s15041_s0 = sld [smem:[#allocation12_spill]] }
  0x21   : > { %s15039_s21 = scalar_select %p13258_p2, 1, 0 }
  0x22   : > { %s214_s30 = scalar_lea.vmem [#allocation2], %s12853_s7  ;;  %s13278_s9 = scalar_lea.sflag [#allocation3], %s210_s29 }
  0x23   : > { %s221_s6 = sshll.u32 %s214_s30, 4  ;;  %p12970_p6 = pneg %p13266_p4  ;;  %s13275_s6 = int_to_ptr.vmem [resolvable:$true] %s221_s6 }
  0x26   : > { %s13273_s11 = scalar_lea.hbm %s15041_s0, %s12854_s10  ;;  %s12973_s8 = scalar_lea.hbm %s15041_s0, 4352 }
  0x27   : > { %s12968_s27 = scalar_lea.hbm %s13273_s11, 2176  ;;  %p12974_p10 = scmp.lt.u32.totalorder %s13273_s11, %s15041_s0 }
  0x28   : > { %p12969_p3 = scmp.ne.s32.totalorder %s13273_s11, %s12968_s27  ;;  %p12975_p11 = scmp.lt.u32.totalorder %s12973_s8, %s12968_s27 }
  0x29   : > { %p12977_p0 = scmp.lt.u32.totalorder %s12968_s27, %s13273_s11 }
  0x2a   : > { %p12971_p8 = pnand %p12970_p6, %p12969_p3  ;;  %p12976_p13 = por %p12975_p11, %p12974_p10 }
  0x2c   : > { %p12972_p9 = pneg %p12971_p8  ;;  %p12978_p1 = por %p12977_p0, %p12976_p13 }
  0x2e   : > { %p12979_p5 = pnand %p12978_p1, %p12972_p9 }
  0x30   : > { %12982 = shalt.err (!%p12979_p5)
}
  0x31   : > { %s12983_s29 = scalar_lea.vmem %s13275_s6, 2176  ;;  %s13122_s30 = smov [#allocation2]  }
  0x32   : > { %p12984_p3 = scmp.ne.s32.totalorder %s13275_s6, %s12983_s29  ;;  %s12988_s10 = sshll.u32 %s13122_s30, 4  ;;  %s12989_s10 = int_to_ptr.vmem [resolvable:$false] %s12988_s10 }
  0x33   : > { %s12990_s26 = scalar_lea.vmem %s12989_s10, 4352  ;;  %p12991_p12 = scmp.lt.s32.totalorder %s13275_s6, %s12989_s10 }
  0x34   : > { %p12986_p8 = pnand %p12984_p3, %p12970_p6  ;;  %p12992_p10 = scmp.lt.s32.totalorder %s12990_s26, %s12983_s29 }
  0x36   : > { %p12987_p2 = pneg %p12986_p8  ;;  %p12993_p11 = por %p12992_p10, %p12991_p12 }
  0x38   : > { %p12994_p13 = pnand %p12993_p11, %p12987_p2 }
  0x3a   : > { %12997 = shalt.err (!%p12994_p13)
}
  0x3b   : > { %s13123_s27 = smov 64   ;;  %s13124_s14 = smov 4  }
  0x3c   : > { %12863 = dma.hbm_to_vmem [thread:$0]  (!%p13266_p4), %s13273_s11, 2176, %s13275_s6, %s13278_s9, %s13123_s27, %s13123_s27, %s13124_s14  }
  0x3d   : > { %p229_p5 = scmp.lt.s32.totalorder %s13120_s28, 5  ;;  %p15042_p6 = scmp.ge.s32.totalorder %s13120_s28, 1 }
  0x3f   : > { %p230_p9 = pnand %p15042_p6, %p229_p5 }
  0x40   : > { %s235_s8 = sand.u32 (!%p230_p9), 1, %s13096_s22  }
  0x41   : > { %233 = sbr.rel (%p230_p9) target bundleno = 867 (0x363), region = 32  ;;  %s236_s29 = scalar_lea.sflag (!%p230_p9), [#allocation3], %s235_s8 }
  0x42   : > { %s12855_s7 = smul.u32 (!%p230_p9), 136, %s235_s8 }
  0x44   : > { %s239_s30 = scalar_lea.vmem (!%p230_p9), [#allocation2], %s12855_s7 }
  0x48   : > { %13071 = dma.done.wait (%p13237_p7), %s236_s29, 2176  }
  0x49   : > { %13073 = vsyncadd (%p13237_p7), %s236_s29, 4294965120  ;;  %s11842_s10 = sshll.u32 %s13104_s24, 6  ;;  %v13125_v0 = vmov 0.0   ;;  %vm13126_vm0 = vmmov 0   ;;  %s13127_s12 = smov 127   ;;  %vm327_vm1 = vcmask 1043456  }
  0x4a   : > { %12133 = vmatprep.subr.mxu0 %v13125_v0  ;;  %12135 = vmatprep.mubr.msk.f32.mxu0 %vm13126_vm0, %v13125_v0  ;;  %s13321_s6 = scalar_lea.vmem %s239_s30, %s11842_s10 [#allocation2]  ;;  %s13128_s13 = smov 126   ;;  %v13538_v33 = vld [vmem:[%s15021_s1 + $0x8] sm:$0xff]  ;;  %vm323_vm2 = vcmask 31744   ;;  %v13634_v50 = vld [vmem:[%s15021_s1] sm:$0xff]  ;;  %v13751_v56 = vld [vmem:[%s15021_s1 + $0x10] sm:$0xff]  ;;  %vm11196_vm4 = vcmask 277504  }
  0x4b   : > { %12138 = vmatprep.subr.mxu1 %v13125_v0  ;;  %12140 = vmatprep.mubr.msk.f32.mxu1 %vm13126_vm0, %v13125_v0  ;;  %v13324_v1 = vld [vmem:[%s13321_s6] sm:$0xf]  ;;  %v13327_v2 = vld [vmem:[%s13321_s6 + $0x8] sm:$0xf]  ;;  %v13334_v3 = vld [vmem:[%s13321_s6 + $0x4] sm:$0xf] }
  0x4c   : > { %321 = vrot.lane.b32.xlu0 %v13324_v1, %s13127_s12  ;;  %476 = vrot.lane.b32.xlu1 %v13327_v2, %s13127_s12  ;;  %v13337_v4 = vld [vmem:[%s13321_s6 + $0xc] sm:$0xf]  ;;  %v13344_v5 = vld [vmem:[%s13321_s6 + $0x10] sm:$0xf]  ;;  %s259_s29 = sand.u32 1, %s13084_s19   ;;  %p15043_p12 = scmp.ne.s32.totalorder %s15038_s15, 0 }
  0x4d   : > { %v13347_v6 = vld [vmem:[%s13321_s6 + $0x14] sm:$0xf]  ;;  %v13354_v7 = vld [vmem:[%s13321_s6 + $0x18] sm:$0xf]  ;;  %v13357_v8 = vld [vmem:[%s13321_s6 + $0x1c] sm:$0xf] }
  0x4e   : > { %v13364_v9 = vld [vmem:[%s13321_s6 + $0x20] sm:$0xf]  ;;  %v13367_v10 = vld [vmem:[%s13321_s6 + $0x24] sm:$0xf]  ;;  %v13374_v11 = vld [vmem:[%s13321_s6 + $0x28] sm:$0xf] }
  0x4f   : > { %v13377_v12 = vld [vmem:[%s13321_s6 + $0x2c] sm:$0xf]  ;;  %v13384_v13 = vld [vmem:[%s13321_s6 + $0x30] sm:$0xf]  ;;  %v13387_v14 = vld [vmem:[%s13321_s6 + $0x34] sm:$0xf] }
  0x50   : > { %401 = vrot.lane.b32.xlu0 %v13334_v3, %s13127_s12  ;;  %551 = vrot.lane.b32.xlu1 %v13337_v4, %s13127_s12  ;;  %v13394_v15 = vld [vmem:[%s13321_s6 + $0x38] sm:$0xf]  ;;  %v13397_v16 = vld [vmem:[%s13321_s6 + $0x3c] sm:$0xf]  ;;  %s11497_s30 = sshll.u32 %s259_s29, 7  ;;  %s14949_s8 = scalar_lea.sflag [#allocation4], %s259_s29 }
  0x51   : > { %v13436_v17 = vld [vmem:[%s13321_s6 + $0x4] sm:$0xf]  ;;  %v13439_v18 = vld [vmem:[%s13321_s6 + $0x8] sm:$0xf]  ;;  %v13446_v19 = vld [vmem:[%s13321_s6 + $0xc] sm:$0xf] }
  0x52   : > { %v13449_v20 = vld [vmem:[%s13321_s6 + $0x10] sm:$0xf]  ;;  %v13456_v21 = vld [vmem:[%s13321_s6 + $0x14] sm:$0xf]  ;;  %v13459_v22 = vld [vmem:[%s13321_s6 + $0x18] sm:$0xf] }
  0x53   : > { %v13466_v23 = vld [vmem:[%s13321_s6 + $0x1c] sm:$0xf]  ;;  %v13469_v24 = vld [vmem:[%s13321_s6 + $0x20] sm:$0xf]  ;;  %v13476_v25 = vld [vmem:[%s13321_s6 + $0x24] sm:$0xf] }
  0x54   : > { %626 = vrot.lane.b32.xlu0 %v13344_v5, %s13127_s12  ;;  %701 = vrot.lane.b32.xlu1 %v13347_v6, %s13127_s12  ;;  %v13479_v26 = vld [vmem:[%s13321_s6 + $0x28] sm:$0xf]  ;;  %v13486_v27 = vld [vmem:[%s13321_s6 + $0x2c] sm:$0xf]  ;;  %s14779_s10 = scalar_lea.vmem [#allocation5], %s11497_s30  ;;  %s13130_s30 = smov [#allocation5]  }
  0x55   : > { %v13489_v28 = vld [vmem:[%s13321_s6 + $0x30] sm:$0xf]  ;;  %v13496_v29 = vld [vmem:[%s13321_s6 + $0x34] sm:$0xf]  ;;  %v13499_v30 = vld [vmem:[%s13321_s6 + $0x38] sm:$0xf] }
  0x56   : > { %v13506_v31 = vld [vmem:[%s13321_s6 + $0x3c] sm:$0xf]  ;;  %v13509_v32 = vld [vmem:[%s13321_s6 + $0x40] sm:$0xf]  ;;  %s11316_s11 = sshll.u32 %s14779_s10, 4  ;;  %s14940_s11 = int_to_ptr.vmem [resolvable:$true] %s11316_s11 }
  0x57   : > { %s12998_s7 = scalar_lea.vmem %s14940_s11, 2048 }
  0x58   : > { %776 = vrot.lane.b32.xlu0 %v13354_v7, %s13127_s12  ;;  %851 = vrot.lane.b32.xlu1 %v13357_v8, %s13127_s12  ;;  %p12999_p7 = scmp.ne.s32.totalorder %s14940_s11, %s12998_s7 }
  0x5a   : > { %p13000_p2 = pnand %p12999_p7, %p15043_p12 }
  0x5c   : > { %926 = vrot.lane.b32.xlu0 %v13364_v9, %s13127_s12  ;;  %1001 = vrot.lane.b32.xlu1 %v13367_v10, %s13127_s12  ;;  %p13001_p4 = pneg %p13000_p2 }
  0x60   : > { %1076 = vrot.lane.b32.xlu0 %v13374_v11, %s13127_s12  ;;  %1151 = vrot.lane.b32.xlu1 %v13377_v12, %s13127_s12 }
  0x64   : > { %1226 = vrot.lane.b32.xlu0 %v13384_v13, %s13127_s12  ;;  %1301 = vrot.lane.b32.xlu1 %v13387_v14, %s13127_s12 }
  0x68   : > { %1376 = vrot.lane.b32.xlu0 %v13394_v15, %s13127_s12  ;;  %1451 = vrot.lane.b32.xlu1 %v13397_v16, %s13127_s12 }
  0x6c   : > { %2682 = vrot.lane.b32.xlu0 %v13324_v1, %s13128_s13  ;;  %2759 = vrot.lane.b32.xlu1 %v13334_v3, %s13128_s13 }
  0x70   : > { %2833 = vrot.lane.b32.xlu0 %v13327_v2, %s13128_s13  ;;  %2907 = vrot.lane.b32.xlu1 %v13337_v4, %s13128_s13 }
  0x74   : > { %2981 = vrot.lane.b32.xlu0 %v13344_v5, %s13128_s13  ;;  %3055 = vrot.lane.b32.xlu1 %v13347_v6, %s13128_s13 }
  0x78   : > { %3129 = vrot.lane.b32.xlu0 %v13354_v7, %s13128_s13  ;;  %3203 = vrot.lane.b32.xlu1 %v13357_v8, %s13128_s13 }
  0x7c   : > { %3277 = vrot.lane.b32.xlu0 %v13364_v9, %s13128_s13  ;;  %3351 = vrot.lane.b32.xlu1 %v13367_v10, %s13128_s13 }
  0x80   : > { %3425 = vrot.lane.b32.xlu0 %v13374_v11, %s13128_s13  ;;  %3499 = vrot.lane.b32.xlu1 %v13377_v12, %s13128_s13 }
  0x84   : > { %3573 = vrot.lane.b32.xlu0 %v13384_v13, %s13128_s13  ;;  %3647 = vrot.lane.b32.xlu1 %v13387_v14, %s13128_s13 }
  0x88   : > { %3721 = vrot.lane.b32.xlu0 %v13394_v15, %s13128_s13  ;;  %3795 = vrot.lane.b32.xlu1 %v13397_v16, %s13128_s13 }
  0x8c   : > { %5095 = vrot.lane.b32.xlu0 %v13436_v17, %s13127_s12  ;;  %5172 = vrot.lane.b32.xlu1 %v13439_v18, %s13127_s12 }
  0x90   : > { %5246 = vrot.lane.b32.xlu0 %v13446_v19, %s13127_s12  ;;  %5320 = vrot.lane.b32.xlu1 %v13449_v20, %s13127_s12 }
  0x94   : > { %5394 = vrot.lane.b32.xlu0 %v13456_v21, %s13127_s12  ;;  %5468 = vrot.lane.b32.xlu1 %v13459_v22, %s13127_s12 }
  0x98   : > { %5542 = vrot.lane.b32.xlu0 %v13466_v23, %s13127_s12  ;;  %5616 = vrot.lane.b32.xlu1 %v13469_v24, %s13127_s12 }
  0x9c   : > { %5690 = vrot.lane.b32.xlu0 %v13476_v25, %s13127_s12  ;;  %5764 = vrot.lane.b32.xlu1 %v13479_v26, %s13127_s12 }
  0xa0   : > { %5838 = vrot.lane.b32.xlu0 %v13486_v27, %s13127_s12  ;;  %5912 = vrot.lane.b32.xlu1 %v13489_v28, %s13127_s12 }
  0xa4   : > { %5986 = vrot.lane.b32.xlu0 %v13496_v29, %s13127_s12  ;;  %6060 = vrot.lane.b32.xlu1 %v13499_v30, %s13127_s12 }
  0xa8   : > { %6134 = vrot.lane.b32.xlu0 %v13506_v31, %s13127_s12  ;;  %6208 = vrot.lane.b32.xlu1 %v13509_v32, %s13127_s12 }
  0xac   : > { %6300 = vrot.lane.b32.xlu0 %v13436_v17, %s13128_s13  ;;  %6377 = vrot.lane.b32.xlu1 %v13439_v18, %s13128_s13 }
  0xb0   : > { %6451 = vrot.lane.b32.xlu0 %v13446_v19, %s13128_s13  ;;  %6525 = vrot.lane.b32.xlu1 %v13449_v20, %s13128_s13 }
  0xb4   : > { %6599 = vrot.lane.b32.xlu0 %v13456_v21, %s13128_s13  ;;  %6673 = vrot.lane.b32.xlu1 %v13459_v22, %s13128_s13 }
  0xb8   : > { %6747 = vrot.lane.b32.xlu0 %v13466_v23, %s13128_s13  ;;  %6821 = vrot.lane.b32.xlu1 %v13469_v24, %s13128_s13 }
  0xbc   : > { %6895 = vrot.lane.b32.xlu0 %v13476_v25, %s13128_s13  ;;  %6969 = vrot.lane.b32.xlu1 %v13479_v26, %s13128_s13 }
  0xbe   : > { %v322_v34 = vpop.permute.xlu0 %321  ;;  %v477_v35 = vpop.permute.xlu1 %476 }
  0xbf   : > { %12134 = vmatpush3.msk.msra.mxu0 %vm327_vm1, %v322_v34 }
  0xc0   : > { %12136 = vmatmul.mubr.msk.f32.vlgmr.msra.gmra.mrb[0].mxu0 %vm323_vm2, %v13538_v33  ;;  %12143 = vmatprep.subr.mxu0 %v13125_v0 }
  0xc1   : > { %12144 = vmatpush3.msk.msra.mxu0 %vm327_vm1, %v477_v35  ;;  %12145 = vmatprep.mubr.msk.f32.mxu0 %vm13126_vm0, %v13125_v0 }
  0xc2   : > { %v402_v36 = vpop.permute.xlu0 %401  ;;  %v552_v37 = vpop.permute.xlu1 %551  ;;  %12153 = vmatprep.subr.mxu0 %v13125_v0  ;;  %7043 = vrot.lane.b32.xlu0 %v13486_v27, %s13128_s13 }
  0xc3   : > { %12139 = vmatpush3.msk.msra.mxu1 %vm327_vm1, %v402_v36  ;;  %7117 = vrot.lane.b32.xlu1 %v13489_v28, %s13128_s13 }
  0xc4   : > { %12141 = vmatmul.mubr.msk.f32.vlgmr.msra.gmra.mrb[0].mxu1 %vm323_vm2, %v13538_v33  ;;  %12146 = vmatmul.mubr.msk.f32.vlgmr.msra.gmra.mrb[2].mxu0 %vm323_vm2, %v13538_v33 }
  0xc5   : > { %12148 = vmatprep.subr.mxu1 %v13125_v0  ;;  %12150 = vmatprep.mubr.msk.f32.mxu1 %vm13126_vm0, %v13125_v0 }
  0xc6   : > { %12149 = vmatpush3.msk.msra.mxu1 %vm327_vm1, %v552_v37  ;;  %v627_v38 = vpop.permute.xlu0 %626  ;;  %12155 = vmatprep.mubr.msk.f32.mxu0 %vm13126_vm0, %v13125_v0  ;;  %v702_v39 = vpop.permute.xlu1 %701 }
  0xc7   : > { %12154 = vmatpush3.msk.msra.mxu0 %vm327_vm1, %v627_v38  ;;  %12158 = vmatprep.subr.mxu1 %v13125_v0 }
  0xc8   : > { %12151 = vmatmul.mubr.msk.f32.vlgmr.msra.gmra.mrb[2].mxu1 %vm323_vm2, %v13538_v33  ;;  %12156 = vmatmul.mubr.msk.f32.vlgmr.msra.gmra.mrb[4].mxu0 %vm323_vm2, %v13538_v33 }
  0xc9   : > { %12159 = vmatpush3.msk.msra.mxu1 %vm327_vm1, %v702_v39  ;;  %12163 = vmatprep.subr.mxu0 %v13125_v0 }
  0xca   : > { %v777_v40 = vpop.permute.xlu0 %776  ;;  %12160 = vmatprep.mubr.msk.f32.mxu1 %vm13126_vm0, %v13125_v0  ;;  %12165 = vmatprep.mubr.msk.f32.mxu0 %vm13126_vm0, %v13125_v0  ;;  %v852_v41 = vpop.permute.xlu1 %851 }
  0xcb   : > { %12164 = vmatpush3.msk.msra.mxu0 %vm327_vm1, %v777_v40  ;;  %12168 = vmatprep.subr.mxu1 %v13125_v0 }
  0xcc   : > { %12161 = vmatmul.mubr.msk.f32.vlgmr.msra.gmra.mrb[4].mxu1 %vm323_vm2, %v13538_v33  ;;  %12166 = vmatmul.mubr.msk.f32.vlgmr.msra.gmra.mrb[6].mxu0 %vm323_vm2, %v13538_v33 }
  0xcd   : > { %12169 = vmatpush3.msk.msra.mxu1 %vm327_vm1, %v852_v41  ;;  %12173 = vmatprep.subr.mxu0 %v13125_v0 }
  0xce   : > { %v927_v42 = vpop.permute.xlu0 %926  ;;  %12170 = vmatprep.mubr.msk.f32.mxu1 %vm13126_vm0, %v13125_v0  ;;  %12175 = vmatprep.mubr.msk.f32.mxu0 %vm13126_vm0, %v13125_v0  ;;  %v1002_v43 = vpop.permute.xlu1 %1001 }
  0xcf   : > { %12174 = vmatpush3.msk.msra.mxu0 %vm327_vm1, %v927_v42  ;;  %12178 = vmatprep.subr.mxu1 %v13125_v0 }
  0xd0   : > { %12171 = vmatmul.mubr.msk.f32.vlgmr.msra.gmra.mrb[6].mxu1 %vm323_vm2, %v13538_v33  ;;  %12176 = vmatmul.mubr.msk.f32.vlgmr.msra.gmra.mrb[8].mxu0 %vm323_vm2, %v13538_v33 }
  0xd1   : > { %12179 = vmatpush3.msk.msra.mxu1 %vm327_vm1, %v1002_v43  ;;  %12183 = vmatprep.subr.mxu0 %v13125_v0 }
  0xd2   : > { %v1077_v44 = vpop.permute.xlu0 %1076  ;;  %12180 = vmatprep.mubr.msk.f32.mxu1 %vm13126_vm0, %v13125_v0  ;;  %12185 = vmatprep.mubr.msk.f32.mxu0 %vm13126_vm0, %v13125_v0  ;;  %v1152_v45 = vpop.permute.xlu1 %1151 }
  0xd3   : > { %12184 = vmatpush3.msk.msra.mxu0 %vm327_vm1, %v1077_v44  ;;  %12188 = vmatprep.subr.mxu1 %v13125_v0  ;;  %v14178_v44 = vld [vmem:[%s15021_s1 + $0x28] sm:$0xff] }
  0xd4   : > { %12181 = vmatmul.mubr.msk.f32.vlgmr.msra.gmra.mrb[8].mxu1 %vm323_vm2, %v13538_v33  ;;  %12186 = vmatmul.mubr.msk.f32.vlgmr.msra.gmra.mrb[10].mxu0 %vm323_vm2, %v13538_v33 }
  0xd5   : > { %12189 = vmatpush3.msk.msra.mxu1 %vm327_vm1, %v1152_v45  ;;  %12193 = vmatprep.subr.mxu0 %v13125_v0 }
  0xd6   : > { %v1227_v46 = vpop.permute.xlu0 %1226  ;;  %12190 = vmatprep.mubr.msk.f32.mxu1 %vm13126_vm0, %v13125_v0  ;;  %12195 = vmatprep.mubr.msk.f32.mxu0 %vm13126_vm0, %v13125_v0  ;;  %v1302_v47 = vpop.permute.xlu1 %1301 }
  0xd7   : > { %12194 = vmatpush3.msk.msra.mxu0 %vm327_vm1, %v1227_v46  ;;  %12198 = vmatprep.subr.mxu1 %v13125_v0 }
  0xd8   : > { %12191 = vmatmul.mubr.msk.f32.vlgmr.msra.gmra.mrb[10].mxu1 %vm323_vm2, %v13538_v33  ;;  %12196 = vmatmul.mubr.msk.f32.vlgmr.msra.gmra.mrb[12].mxu0 %vm323_vm2, %v13538_v33 }
  0xd9   : > { %12199 = vmatpush3.msk.msra.mxu1 %vm327_vm1, %v1302_v47  ;;  %12203 = vmatprep.subr.mxu0 %v13125_v0 }
  0xda   : > { %v1377_v48 = vpop.permute.xlu0 %1376  ;;  %12200 = vmatprep.mubr.msk.f32.mxu1 %vm13126_vm0, %v13125_v0  ;;  %12205 = vmatprep.mubr.msk.f32.mxu0 %vm13126_vm0, %v13125_v0  ;;  %v1452_v49 = vpop.permute.xlu1 %1451 }
  0xdb   : > { %12204 = vmatpush3.msk.msra.mxu0 %vm327_vm1, %v1377_v48  ;;  %12208 = vmatprep.subr.mxu1 %v13125_v0 }
  0xdc   : > { %12201 = vmatmul.mubr.msk.f32.vlgmr.msra.gmra.mrb[12].mxu1 %vm323_vm2, %v13538_v33  ;;  %12206 = vmatmul.mubr.msk.f32.vlgmr.msra.gmra.mrb[14].mxu0 %vm323_vm2, %v13538_v33 }
  0xdd   : > { %12209 = vmatpush3.msk.msra.mxu1 %vm327_vm1, %v1452_v49  ;;  %12213 = vmatprep.subr.mxu0 %v13125_v0 }
  0xde   : > { %12210 = vmatprep.mubr.msk.f32.mxu1 %vm13126_vm0, %v13125_v0  ;;  %12214 = vmatpush3.msk.msra.mxu0 %vm327_vm1, %v13324_v1  ;;  %v2683_v51 = vpop.permute.xlu0 %2682  ;;  %v2760_v52 = vpop.permute.xlu1 %2759 }
  0xdf   : > { %12215 = vmatprep.mubr.msk.f32.mxu0 %vm13126_vm0, %v13125_v0  ;;  %12218 = vmatprep.subr.mxu1 %v13125_v0 }
  0xe0   : > { %12211 = vmatmul.mubr.msk.f32.vlgmr.msra.gmra.mrb[14].mxu1 %vm323_vm2, %v13538_v33  ;;  %12216 = vmatmul.mubr.msk.f32.vlgmr.msra.gmra.mrb[16].mxu0 %vm323_vm2, %v13634_v50  ;;  %v14080_v33 = vld [vmem:[%s13321_s6 + $0x44] sm:$0xf] }
  0xe1   : > { %12219 = vmatpush3.msk.msra.mxu1 %vm327_vm1, %v13334_v3  ;;  %12223 = vmatprep.subr.mxu0 %v13125_v0 }
  0xe2   : > { %12220 = vmatprep.mubr.msk.f32.mxu1 %vm13126_vm0, %v13125_v0  ;;  %12224 = vmatpush3.msk.msra.mxu0 %vm327_vm1, %v13327_v2  ;;  %v2834_v53 = vpop.permute.xlu0 %2833  ;;  %v2908_v54 = vpop.permute.xlu1 %2907 }
  0xe3   : > { %12225 = vmatprep.mubr.msk.f32.mxu0 %vm13126_vm0, %v13125_v0  ;;  %12228 = vmatprep.subr.mxu1 %v13125_v0 }
  0xe4   : > { %12221 = vmatmul.mubr.msk.f32.vlgmr.msra.gmra.mrb[16].mxu1 %vm323_vm2, %v13634_v50  ;;  %12226 = vmatmul.mubr.msk.f32.vlgmr.msra.gmra.mrb[18].mxu0 %vm323_vm2, %v13634_v50 }
  0xe5   : > { %12229 = vmatpush3.msk.msra.mxu1 %vm327_vm1, %v13337_v4  ;;  %12233 = vmatprep.subr.mxu0 %v13125_v0 }
  0xe6   : > { %12230 = vmatprep.mubr.msk.f32.mxu1 %vm13126_vm0, %v13125_v0  ;;  %12234 = vmatpush3.msk.msra.mxu0 %vm327_vm1, %v13344_v5  ;;  %v2982_v55 = vpop.permute.xlu0 %2981  ;;  %v3056_v57 = vpop.permute.xlu1 %3055  ;;  %v13860_v5 = vld [vmem:[%s15021_s1 + $0x18] sm:$0xff] }
  0xe7   : > { %12235 = vmatprep.mubr.msk.f32.mxu0 %vm13126_vm0, %v13125_v0  ;;  %12238 = vmatprep.subr.mxu1 %v13125_v0 }
  0xe8   : > { %12231 = vmatmul.mubr.msk.f32.vlgmr.msra.gmra.mrb[18].mxu1 %vm323_vm2, %v13634_v50  ;;  %12236 = vmatmul.mubr.msk.f32.vlgmr.msra.gmra.mrb[20].mxu0 %vm323_vm2, %v13634_v50 }
  0xe9   : > { %12239 = vmatpush3.msk.msra.mxu1 %vm327_vm1, %v13347_v6  ;;  %12243 = vmatprep.subr.mxu0 %v13125_v0  ;;  %v13902_v6 = vld [vmem:[%s13321_s6 + $0x8] sm:$0xf] }
  0xea   : > { %12240 = vmatprep.mubr.msk.f32.mxu1 %vm13126_vm0, %v13125_v0  ;;  %12244 = vmatpush3.msk.msra.mxu0 %vm327_vm1, %v13354_v7  ;;  %v3130_v58 = vpop.permute.xlu0 %3129  ;;  %v3204_v59 = vpop.permute.xlu1 %3203  ;;  %v13912_v7 = vld [vmem:[%s13321_s6 + $0xc] sm:$0xf] }
  0xeb   : > { %12245 = vmatprep.mubr.msk.f32.mxu0 %vm13126_vm0, %v13125_v0  ;;  %12248 = vmatprep.subr.mxu1 %v13125_v0 }
  0xec   : > { %12241 = vmatmul.mubr.msk.f32.vlgmr.msra.gmra.mrb[20].mxu1 %vm323_vm2, %v13634_v50  ;;  %12246 = vmatmul.mubr.msk.f32.vlgmr.msra.gmra.mrb[22].mxu0 %vm323_vm2, %v13634_v50 }
  0xed   : > { %12249 = vmatpush3.msk.msra.mxu1 %vm327_vm1, %v13357_v8  ;;  %12253 = vmatprep.subr.mxu0 %v13125_v0  ;;  %v13926_v8 = vld [vmem:[%s13321_s6 + $0x10] sm:$0xf] }
  0xee   : > { %12250 = vmatprep.mubr.msk.f32.mxu1 %vm13126_vm0, %v13125_v0  ;;  %12254 = vmatpush3.msk.msra.mxu0 %vm327_vm1, %v13364_v9  ;;  %v3278_v60 = vpop.permute.xlu0 %3277  ;;  %v3352_v61 = vpop.permute.xlu1 %3351 }
  0xef   : > { %12255 = vmatprep.mubr.msk.f32.mxu0 %vm13126_vm0, %v13125_v0  ;;  %12258 = vmatprep.subr.mxu1 %v13125_v0 }
  0xf0   : > { %12251 = vmatmul.mubr.msk.f32.vlgmr.msra.gmra.mrb[22].mxu1 %vm323_vm2, %v13634_v50  ;;  %12256 = vmatmul.mubr.msk.f32.vlgmr.msra.gmra.mrb[24].mxu0 %vm323_vm2, %v13634_v50 }
  0xf1   : > { %12259 = vmatpush3.msk.msra.mxu1 %vm327_vm1, %v13367_v10  ;;  %12263 = vmatprep.subr.mxu0 %v13125_v0  ;;  %v13936_v10 = vld [vmem:[%s13321_s6 + $0x14] sm:$0xf] }
  0xf2   : > { %12260 = vmatprep.mubr.msk.f32.mxu1 %vm13126_vm0, %v13125_v0  ;;  %12264 = vmatpush3.msk.msra.mxu0 %vm327_vm1, %v13374_v11  ;;  %v3426_v62 = vpop.permute.xlu0 %3425  ;;  %v3500_v63 = vpop.permute.xlu1 %3499 }
  0xf3   : > { %12265 = vmatprep.mubr.msk.f32.mxu0 %vm13126_vm0, %v13125_v0  ;;  %12268 = vmatprep.subr.mxu1 %v13125_v0 }
  0xf4   : > { %12261 = vmatmul.mubr.msk.f32.vlgmr.msra.gmra.mrb[24].mxu1 %vm323_vm2, %v13634_v50  ;;  %12266 = vmatmul.mubr.msk.f32.vlgmr.msra.gmra.mrb[26].mxu0 %vm323_vm2, %v13634_v50 }
  0xf5   : > { %12269 = vmatpush3.msk.msra.mxu1 %vm327_vm1, %v13377_v12  ;;  %12273 = vmatprep.subr.mxu0 %v13125_v0  ;;  %v13950_v12 = vld [vmem:[%s13321_s6 + $0x18] sm:$0xf] }
  0xf6   : > { %12270 = vmatprep.mubr.msk.f32.mxu1 %vm13126_vm0, %v13125_v0  ;;  %12274 = vmatpush3.msk.msra.mxu0 %vm327_vm1, %v13384_v13  ;;  %v3574_v1 = vpop.permute.xlu0 %3573  ;;  %v3648_v2 = vpop.permute.xlu1 %3647 }
  0xf7   : > { %12275 = vmatprep.mubr.msk.f32.mxu0 %vm13126_vm0, %v13125_v0  ;;  %12278 = vmatprep.subr.mxu1 %v13125_v0 }
  0xf8   : > { %12271 = vmatmul.mubr.msk.f32.vlgmr.msra.gmra.mrb[26].mxu1 %vm323_vm2, %v13634_v50  ;;  %12276 = vmatmul.mubr.msk.f32.vlgmr.msra.gmra.mrb[28].mxu0 %vm323_vm2, %v13634_v50 }
  0xf9   : > { %12279 = vmatpush3.msk.msra.mxu1 %vm327_vm1, %v13387_v14  ;;  %12283 = vmatprep.subr.mxu0 %v13125_v0  ;;  %v13960_v14 = vld [vmem:[%s13321_s6 + $0x1c] sm:$0xf] }
  0xfa   : > { %12280 = vmatprep.mubr.msk.f32.mxu1 %vm13126_vm0, %v13125_v0  ;;  %12284 = vmatpush3.msk.msra.mxu0 %vm327_vm1, %v13394_v15  ;;  %v3722_v3 = vpop.permute.xlu0 %3721  ;;  %v3796_v4 = vpop.permute.xlu1 %3795 }
  0xfb   : > { %12285 = vmatprep.mubr.msk.f32.mxu0 %vm13126_vm0, %v13125_v0  ;;  %12288 = vmatprep.subr.mxu1 %v13125_v0 }
  0xfc   : > { %12281 = vmatmul.mubr.msk.f32.vlgmr.msra.gmra.mrb[28].mxu1 %vm323_vm2, %v13634_v50  ;;  %12286 = vmatmul.mubr.msk.f32.vlgmr.msra.gmra.mrb[30].mxu0 %vm323_vm2, %v13634_v50 }
  0xfd   : > { %12289 = vmatpush3.msk.msra.mxu1 %vm327_vm1, %v13397_v16  ;;  %12293 = vmatprep.subr.mxu0 %v13125_v0  ;;  %v13974_v16 = vld [vmem:[%s13321_s6 + $0x20] sm:$0xf] }
  0xfe   : > { %12290 = vmatprep.mubr.msk.f32.mxu1 %vm13126_vm0, %v13125_v0  ;;  %12294 = vmatpush3.msk.msra.mxu0 %vm327_vm1, %v2683_v51  ;;  %v5096_v9 = vpop.permute.xlu0 %5095  ;;  %v5173_v11 = vpop.permute.xlu1 %5172 }
  0xff   : > { %12295 = vmatprep.mubr.msk.f32.mxu0 %vm13126_vm0, %v13125_v0  ;;  %12298 = vmatprep.subr.mxu1 %v13125_v0 }
 0x100   : > { %12291 = vmatmul.mubr.msk.f32.vlgmr.msra.gmra.mrb[30].mxu1 %vm323_vm2, %v13634_v50  ;;  %12296 = vmatmul.mubr.msk.f32.vlgmr.msra.gmra.mrb[32].mxu0 %vm323_vm2, %v13751_v56 }
 0x101   : > { %12299 = vmatpush3.msk.msra.mxu1 %vm327_vm1, %v2760_v52  ;;  %12303 = vmatprep.subr.mxu0 %v13125_v0 }
 0x102   : > { %12300 = vmatprep.mubr.msk.f32.mxu1 %vm13126_vm0, %v13125_v0  ;;  %12304 = vmatpush3.msk.msra.mxu0 %vm327_vm1, %v2834_v53  ;;  %v5247_v13 = vpop.permute.xlu0 %5246  ;;  %v5321_v15 = vpop.permute.xlu1 %5320 }
 0x103   : > { %12305 = vmatprep.mubr.msk.f32.mxu0 %vm13126_vm0, %v13125_v0  ;;  %7191 = vrot.lane.b32.xlu0 %v13496_v29, %s13128_s13 }
 0x104   : > { %12301 = vmatmul.mubr.msk.f32.vlgmr.msra.gmra.mrb[32].mxu1 %vm323_vm2, %v13751_v56  ;;  %12306 = vmatmul.mubr.msk.f32.vlgmr.msra.gmra.mrb[34].mxu0 %vm323_vm2, %v13751_v56 }
 0x105   : > { %12308 = vmatprep.subr.mxu1 %v13125_v0  ;;  %7265 = vrot.lane.b32.xlu1 %v13499_v30, %s13128_s13 }
 0x106   : > { %12309 = vmatpush3.msk.msra.mxu1 %vm327_vm1, %v2908_v54  ;;  %12313 = vmatprep.subr.mxu0 %v13125_v0 }
 0x107   : > { %12310 = vmatprep.mubr.msk.f32.mxu1 %vm13126_vm0, %v13125_v0  ;;  %12314 = vmatpush3.msk.msra.mxu0 %vm327_vm1, %v2982_v55 }
 0x108   : > { %12315 = vmatprep.mubr.msk.f32.mxu0 %vm13126_vm0, %v13125_v0  ;;  %7339 = vrot.lane.b32.xlu0 %v13506_v31, %s13128_s13 }
 0x109   : > { %12311 = vmatmul.mubr.msk.f32.vlgmr.msra.gmra.mrb[34].mxu1 %vm323_vm2, %v13751_v56  ;;  %12316 = vmatmul.mubr.msk.f32.vlgmr.msra.gmra.mrb[36].mxu0 %vm323_vm2, %v13751_v56 }
 0x10a   : > { %12318 = vmatprep.subr.mxu1 %v13125_v0  ;;  %7413 = vrot.lane.b32.xlu1 %v13509_v32, %s13128_s13 }
 0x10b   : > { %12319 = vmatpush3.msk.msra.mxu1 %vm327_vm1, %v3056_v57  ;;  %12323 = vmatprep.subr.mxu0 %v13125_v0 }
 0x10c   : > { %12320 = vmatprep.mubr.msk.f32.mxu1 %vm13126_vm0, %v13125_v0  ;;  %12324 = vmatpush3.msk.msra.mxu0 %vm327_vm1, %v3130_v58 }
 0x10d   : > { %12325 = vmatprep.mubr.msk.f32.mxu0 %vm13126_vm0, %v13125_v0  ;;  %12321 = vmatmul.mubr.msk.f32.vlgmr.msra.gmra.mrb[36].mxu1 %vm323_vm2, %v13751_v56 }
 0x10e   : > { %12326 = vmatmul.mubr.msk.f32.vlgmr.msra.gmra.mrb[38].mxu0 %vm323_vm2, %v13751_v56  ;;  %12328 = vmatprep.subr.mxu1 %v13125_v0 }
 0x10f   : > { %12329 = vmatpush3.msk.msra.mxu1 %vm327_vm1, %v3204_v59  ;;  %12333 = vmatprep.subr.mxu0 %v13125_v0 }
 0x110   : > { %12330 = vmatprep.mubr.msk.f32.mxu1 %vm13126_vm0, %v13125_v0  ;;  %12334 = vmatpush3.msk.msra.mxu0 %vm327_vm1, %v3278_v60 }
 0x111   : > { %12335 = vmatprep.mubr.msk.f32.mxu0 %vm13126_vm0, %v13125_v0  ;;  %12331 = vmatmul.mubr.msk.f32.vlgmr.msra.gmra.mrb[38].mxu1 %vm323_vm2, %v13751_v56 }
 0x112   : > { %12336 = vmatmul.mubr.msk.f32.vlgmr.msra.gmra.mrb[40].mxu0 %vm323_vm2, %v13751_v56  ;;  %12338 = vmatprep.subr.mxu1 %v13125_v0 }
 0x113   : > { %12339 = vmatpush3.msk.msra.mxu1 %vm327_vm1, %v3352_v61  ;;  %12343 = vmatprep.subr.mxu0 %v13125_v0 }
 0x114   : > { %12340 = vmatprep.mubr.msk.f32.mxu1 %vm13126_vm0, %v13125_v0  ;;  %12344 = vmatpush3.msk.msra.mxu0 %vm327_vm1, %v3426_v62 }
 0x115   : > { %12345 = vmatprep.mubr.msk.f32.mxu0 %vm13126_vm0, %v13125_v0  ;;  %12341 = vmatmul.mubr.msk.f32.vlgmr.msra.gmra.mrb[40].mxu1 %vm323_vm2, %v13751_v56 }
 0x116   : > { %12346 = vmatmul.mubr.msk.f32.vlgmr.msra.gmra.mrb[42].mxu0 %vm323_vm2, %v13751_v56  ;;  %12348 = vmatprep.subr.mxu1 %v13125_v0 }
 0x117   : > { %12349 = vmatpush3.msk.msra.mxu1 %vm327_vm1, %v3500_v63  ;;  %12353 = vmatprep.subr.mxu0 %v13125_v0 }
 0x118   : > { %12350 = vmatprep.mubr.msk.f32.mxu1 %vm13126_vm0, %v13125_v0  ;;  %12354 = vmatpush3.msk.msra.mxu0 %vm327_vm1, %v3574_v1 }
 0x119   : > { %12355 = vmatprep.mubr.msk.f32.mxu0 %vm13126_vm0, %v13125_v0  ;;  %12351 = vmatmul.mubr.msk.f32.vlgmr.msra.gmra.mrb[42].mxu1 %vm323_vm2, %v13751_v56 }
 0x11a   : > { %12356 = vmatmul.mubr.msk.f32.vlgmr.msra.gmra.mrb[44].mxu0 %vm323_vm2, %v13751_v56  ;;  %12358 = vmatprep.subr.mxu1 %v13125_v0 }
 0x11b   : > { %12359 = vmatpush3.msk.msra.mxu1 %vm327_vm1, %v3648_v2  ;;  %12363 = vmatprep.subr.mxu0 %v13125_v0 }
 0x11c   : > { %12360 = vmatprep.mubr.msk.f32.mxu1 %vm13126_vm0, %v13125_v0  ;;  %12364 = vmatpush3.msk.msra.mxu0 %vm327_vm1, %v3722_v3 }
 0x11d   : > { %12365 = vmatprep.mubr.msk.f32.mxu0 %vm13126_vm0, %v13125_v0  ;;  %12361 = vmatmul.mubr.msk.f32.vlgmr.msra.gmra.mrb[44].mxu1 %vm323_vm2, %v13751_v56 }
 0x11e   : > { %12366 = vmatmul.mubr.msk.f32.vlgmr.msra.gmra.mrb[46].mxu0 %vm323_vm2, %v13751_v56  ;;  %12368 = vmatprep.subr.mxu1 %v13125_v0 }
 0x11f   : > { %12369 = vmatpush3.msk.msra.mxu1 %vm327_vm1, %v3796_v4  ;;  %12373 = vmatprep.subr.mxu0 %v13125_v0 }
 0x120   : > { %12370 = vmatprep.mubr.msk.f32.mxu1 %vm13126_vm0, %v13125_v0  ;;  %12374 = vmatpush3.msk.msra.mxu0 %vm327_vm1, %v13436_v17  ;;  %v13984_v17 = vld [vmem:[%s13321_s6 + $0x24] sm:$0xf] }
 0x121   : > { %12375 = vmatprep.mubr.msk.f32.mxu0 %vm13126_vm0, %v13125_v0  ;;  %12371 = vmatmul.mubr.msk.f32.vlgmr.msra.gmra.mrb[46].mxu1 %vm323_vm2, %v13751_v56  ;;  %v14291_v56 = vld [vmem:[%s15021_s1 + $0x30] sm:$0xff] }
 0x122   : > { %12376 = vmatmul.mubr.msk.f32.vlgmr.msra.gmra.mrb[48].mxu0 %vm323_vm2, %v13860_v5  ;;  %12378 = vmatprep.subr.mxu1 %v13125_v0 }
 0x123   : > { %12379 = vmatpush3.msk.msra.mxu1 %vm327_vm1, %v13439_v18  ;;  %12383 = vmatprep.subr.mxu0 %v13125_v0  ;;  %v5395_v18 = vpop.permute.xlu0 %5394 }
 0x124   : > { %12380 = vmatprep.mubr.msk.f32.mxu1 %vm13126_vm0, %v13125_v0  ;;  %12384 = vmatpush3.msk.msra.mxu0 %vm327_vm1, %v13446_v19  ;;  %v13998_v19 = vld [vmem:[%s13321_s6 + $0x28] sm:$0xf] }
 0x125   : > { %12385 = vmatprep.mubr.msk.f32.mxu0 %vm13126_vm0, %v13125_v0  ;;  %12381 = vmatmul.mubr.msk.f32.vlgmr.msra.gmra.mrb[48].mxu1 %vm323_vm2, %v13860_v5 }
 0x126   : > { %12386 = vmatmul.mubr.msk.f32.vlgmr.msra.gmra.mrb[50].mxu0 %vm323_vm2, %v13860_v5  ;;  %12388 = vmatprep.subr.mxu1 %v13125_v0 }
 0x127   : > { %12389 = vmatpush3.msk.msra.mxu1 %vm327_vm1, %v13449_v20  ;;  %12393 = vmatprep.subr.mxu0 %v13125_v0  ;;  %v5469_v20 = vpop.permute.xlu1 %5468 }
 0x128   : > { %12390 = vmatprep.mubr.msk.f32.mxu1 %vm13126_vm0, %v13125_v0  ;;  %12394 = vmatpush3.msk.msra.mxu0 %vm327_vm1, %v13456_v21  ;;  %v14008_v21 = vld [vmem:[%s13321_s6 + $0x2c] sm:$0xf] }
 0x129   : > { %12395 = vmatprep.mubr.msk.f32.mxu0 %vm13126_vm0, %v13125_v0  ;;  %12391 = vmatmul.mubr.msk.f32.vlgmr.msra.gmra.mrb[50].mxu1 %vm323_vm2, %v13860_v5 }
 0x12a   : > { %12396 = vmatmul.mubr.msk.f32.vlgmr.msra.gmra.mrb[52].mxu0 %vm323_vm2, %v13860_v5  ;;  %12398 = vmatprep.subr.mxu1 %v13125_v0 }
 0x12b   : > { %12399 = vmatpush3.msk.msra.mxu1 %vm327_vm1, %v13459_v22  ;;  %12403 = vmatprep.subr.mxu0 %v13125_v0  ;;  %v5543_v22 = vpop.permute.xlu0 %5542 }
 0x12c   : > { %12400 = vmatprep.mubr.msk.f32.mxu1 %vm13126_vm0, %v13125_v0  ;;  %12404 = vmatpush3.msk.msra.mxu0 %vm327_vm1, %v13466_v23  ;;  %v14022_v23 = vld [vmem:[%s13321_s6 + $0x30] sm:$0xf] }
 0x12d   : > { %12405 = vmatprep.mubr.msk.f32.mxu0 %vm13126_vm0, %v13125_v0  ;;  %8713 = vrot.lane.b32.xlu0 %v13902_v6, %s13127_s12 }
 0x12e   : > { %12401 = vmatmul.mubr.msk.f32.vlgmr.msra.gmra.mrb[52].mxu1 %vm323_vm2, %v13860_v5  ;;  %12406 = vmatmul.mubr.msk.f32.vlgmr.msra.gmra.mrb[54].mxu0 %vm323_vm2, %v13860_v5 }
 0x12f   : > { %12408 = vmatprep.subr.mxu1 %v13125_v0  ;;  %8790 = vrot.lane.b32.xlu1 %v13912_v7, %s13127_s12 }
 0x130   : > { %12409 = vmatpush3.msk.msra.mxu1 %vm327_vm1, %v13469_v24  ;;  %12413 = vmatprep.subr.mxu0 %v13125_v0  ;;  %v14030_v24 = vld [vmem:[%s15021_s1 + $0x20] sm:$0xff] }
 0x131   : > { %12410 = vmatprep.mubr.msk.f32.mxu1 %vm13126_vm0, %v13125_v0  ;;  %12414 = vmatpush3.msk.msra.mxu0 %vm327_vm1, %v13476_v25  ;;  %v5617_v25 = vpop.permute.xlu1 %5616 }
 0x132   : > { %12415 = vmatprep.mubr.msk.f32.mxu0 %vm13126_vm0, %v13125_v0  ;;  %8864 = vrot.lane.b32.xlu0 %v13926_v8, %s13127_s12 }
 0x133   : > { %12411 = vmatmul.mubr.msk.f32.vlgmr.msra.gmra.mrb[54].mxu1 %vm323_vm2, %v13860_v5  ;;  %12416 = vmatmul.mubr.msk.f32.vlgmr.msra.gmra.mrb[56].mxu0 %vm323_vm2, %v13860_v5 }
 0x134   : > { %12418 = vmatprep.subr.mxu1 %v13125_v0  ;;  %8938 = vrot.lane.b32.xlu1 %v13936_v10, %s13127_s12 }
 0x135   : > { %12419 = vmatpush3.msk.msra.mxu1 %vm327_vm1, %v13479_v26  ;;  %12423 = vmatprep.subr.mxu0 %v13125_v0  ;;  %v14036_v26 = vld [vmem:[%s13321_s6 + $0x34] sm:$0xf] }
 0x136   : > { %12420 = vmatprep.mubr.msk.f32.mxu1 %vm13126_vm0, %v13125_v0  ;;  %12424 = vmatpush3.msk.msra.mxu0 %vm327_vm1, %v13486_v27  ;;  %v5691_v27 = vpop.permute.xlu0 %5690 }
 0x137   : > { %12425 = vmatprep.mubr.msk.f32.mxu0 %vm13126_vm0, %v13125_v0  ;;  %9012 = vrot.lane.b32.xlu0 %v13950_v12, %s13127_s12 }
 0x138   : > { %12421 = vmatmul.mubr.msk.f32.vlgmr.msra.gmra.mrb[56].mxu1 %vm323_vm2, %v13860_v5  ;;  %12426 = vmatmul.mubr.msk.f32.vlgmr.msra.gmra.mrb[58].mxu0 %vm323_vm2, %v13860_v5 }
 0x139   : > { %12428 = vmatprep.subr.mxu1 %v13125_v0  ;;  %9086 = vrot.lane.b32.xlu1 %v13960_v14, %s13127_s12 }
 0x13a   : > { %12429 = vmatpush3.msk.msra.mxu1 %vm327_vm1, %v13489_v28  ;;  %12433 = vmatprep.subr.mxu0 %v13125_v0  ;;  %v14050_v28 = vld [vmem:[%s13321_s6 + $0x38] sm:$0xf] }
 0x13b   : > { %12430 = vmatprep.mubr.msk.f32.mxu1 %vm13126_vm0, %v13125_v0  ;;  %12434 = vmatpush3.msk.msra.mxu0 %vm327_vm1, %v13496_v29  ;;  %v14058_v29 = vld [vmem:[%s13321_s6 + $0x3c] sm:$0xf] }
 0x13c   : > { %12435 = vmatprep.mubr.msk.f32.mxu0 %vm13126_vm0, %v13125_v0  ;;  %9160 = vrot.lane.b32.xlu0 %v13974_v16, %s13127_s12 }
 0x13d   : > { %12431 = vmatmul.mubr.msk.f32.vlgmr.msra.gmra.mrb[58].mxu1 %vm323_vm2, %v13860_v5  ;;  %12436 = vmatmul.mubr.msk.f32.vlgmr.msra.gmra.mrb[60].mxu0 %vm323_vm2, %v13860_v5 }
 0x13e   : > { %12438 = vmatprep.subr.mxu1 %v13125_v0  ;;  %9234 = vrot.lane.b32.xlu1 %v13984_v17, %s13127_s12 }
 0x13f   : > { %12439 = vmatpush3.msk.msra.mxu1 %vm327_vm1, %v13499_v30  ;;  %12443 = vmatprep.subr.mxu0 %v13125_v0  ;;  %v5765_v30 = vpop.permute.xlu1 %5764 }
 0x140   : > { %12440 = vmatprep.mubr.msk.f32.mxu1 %vm13126_vm0, %v13125_v0  ;;  %12444 = vmatpush3.msk.msra.mxu0 %vm327_vm1, %v13506_v31  ;;  %v14072_v31 = vld [vmem:[%s13321_s6 + $0x40] sm:$0xf]  ;;  %s11837_s6 = sshll.u32 %s13104_s24, 4 }
 0x141   : > { %12445 = vmatprep.mubr.msk.f32.mxu0 %vm13126_vm0, %v13125_v0  ;;  %9308 = vrot.lane.b32.xlu0 %v13998_v19, %s13127_s12 }
 0x142   : > { %12441 = vmatmul.mubr.msk.f32.vlgmr.msra.gmra.mrb[60].mxu1 %vm323_vm2, %v13860_v5  ;;  %12446 = vmatmul.mubr.msk.f32.vlgmr.msra.gmra.mrb[62].mxu0 %vm323_vm2, %v13860_v5 }
 0x143   : > { %12448 = vmatprep.subr.mxu1 %v13125_v0  ;;  %9382 = vrot.lane.b32.xlu1 %v14008_v21, %s13127_s12  ;;  %v5913_v34 = vpop.permute.xlu1 %5912 }
 0x144   : > { %12449 = vmatpush3.msk.msra.mxu1 %vm327_vm1, %v13509_v32  ;;  %12453 = vmatprep.subr.mxu0 %v13125_v0  ;;  %v5839_v32 = vpop.permute.xlu0 %5838 }
 0x145   : > { %12450 = vmatprep.mubr.msk.f32.mxu1 %vm13126_vm0, %v13125_v0  ;;  %12454 = vmatpush3.msk.msra.mxu0 %vm327_vm1, %v5096_v9 }
 0x146   : > { %12455 = vmatprep.mubr.msk.f32.mxu0 %vm13126_vm0, %v13125_v0  ;;  %9456 = vrot.lane.b32.xlu0 %v14022_v23, %s13127_s12 }
 0x147   : > { %12451 = vmatmul.mubr.msk.f32.vlgmr.msra.gmra.mrb[62].mxu1 %vm323_vm2, %v13860_v5  ;;  %12456 = vmatmul.mubr.msk.f32.vlgmr.msra.gmra.mrb[64].mxu0 %vm323_vm2, %v14030_v24  ;;  %v6061_v36 = vpop.permute.xlu1 %6060 }
 0x148   : > { %12458 = vmatprep.subr.mxu1 %v13125_v0  ;;  %9530 = vrot.lane.b32.xlu1 %v14036_v26, %s13127_s12  ;;  %v5987_v35 = vpop.permute.xlu0 %5986 }
 0x149   : > { %12459 = vmatpush3.msk.msra.mxu1 %vm327_vm1, %v5173_v11  ;;  %12463 = vmatprep.subr.mxu0 %v13125_v0 }
 0x14a   : > { %12460 = vmatprep.mubr.msk.f32.mxu1 %vm13126_vm0, %v13125_v0  ;;  %12464 = vmatpush3.msk.msra.mxu0 %vm327_vm1, %v5247_v13 }
 0x14b   : > { %12465 = vmatprep.mubr.msk.f32.mxu0 %vm13126_vm0, %v13125_v0  ;;  %9604 = vrot.lane.b32.xlu0 %v14050_v28, %s13127_s12  ;;  %v6209_v38 = vpop.permute.xlu1 %6208 }
 0x14c   : > { %12461 = vmatmul.mubr.msk.f32.vlgmr.msra.gmra.mrb[64].mxu1 %vm323_vm2, %v14030_v24  ;;  %12466 = vmatmul.mubr.msk.f32.vlgmr.msra.gmra.mrb[66].mxu0 %vm323_vm2, %v14030_v24  ;;  %v6135_v37 = vpop.permute.xlu0 %6134 }
 0x14d   : > { %12468 = vmatprep.subr.mxu1 %v13125_v0  ;;  %9678 = vrot.lane.b32.xlu1 %v14058_v29, %s13127_s12 }
 0x14e   : > { %12469 = vmatpush3.msk.msra.mxu1 %vm327_vm1, %v5321_v15  ;;  %12473 = vmatprep.subr.mxu0 %v13125_v0 }
 0x14f   : > { %12470 = vmatprep.mubr.msk.f32.mxu1 %vm13126_vm0, %v13125_v0  ;;  %12474 = vmatpush3.msk.msra.mxu0 %vm327_vm1, %v5395_v18  ;;  %v6378_v40 = vpop.permute.xlu1 %6377 }
 0x150   : > { %12475 = vmatprep.mubr.msk.f32.mxu0 %vm13126_vm0, %v13125_v0  ;;  %9752 = vrot.lane.b32.xlu0 %v14072_v31, %s13127_s12  ;;  %v6301_v39 = vpop.permute.xlu0 %6300 }
 0x151   : > { %12471 = vmatmul.mubr.msk.f32.vlgmr.msra.gmra.mrb[66].mxu1 %vm323_vm2, %v14030_v24  ;;  %12476 = vmatmul.mubr.msk.f32.vlgmr.msra.gmra.mrb[68].mxu0 %vm323_vm2, %v14030_v24 }
 0x152   : > { %12478 = vmatprep.subr.mxu1 %v13125_v0  ;;  %9826 = vrot.lane.b32.xlu1 %v14080_v33, %s13127_s12  ;;  %s11838_s12 = sshll.u32 %s13108_s25, 5 }
 0x153   : > { %12479 = vmatpush3.msk.msra.mxu1 %vm327_vm1, %v5469_v20  ;;  %12483 = vmatprep.subr.mxu0 %v13125_v0  ;;  %v6526_v42 = vpop.permute.xlu1 %6525 }
 0x154   : > { %12480 = vmatprep.mubr.msk.f32.mxu1 %vm13126_vm0, %v13125_v0  ;;  %12484 = vmatpush3.msk.msra.mxu0 %vm327_vm1, %v5543_v22  ;;  %v6452_v41 = vpop.permute.xlu0 %6451 }
 0x155   : > { %12485 = vmatprep.mubr.msk.f32.mxu0 %vm13126_vm0, %v13125_v0  ;;  %9918 = vrot.lane.b32.xlu0 %v13902_v6, %s13128_s13 }
 0x156   : > { %12481 = vmatmul.mubr.msk.f32.vlgmr.msra.gmra.mrb[68].mxu1 %vm323_vm2, %v14030_v24  ;;  %12486 = vmatmul.mubr.msk.f32.vlgmr.msra.gmra.mrb[70].mxu0 %vm323_vm2, %v14030_v24 }
 0x157   : > { %12488 = vmatprep.subr.mxu1 %v13125_v0  ;;  %9995 = vrot.lane.b32.xlu1 %v13912_v7, %s13128_s13  ;;  %v6674_v45 = vpop.permute.xlu1 %6673 }
 0x158   : > { %12489 = vmatpush3.msk.msra.mxu1 %vm327_vm1, %v5617_v25  ;;  %12493 = vmatprep.subr.mxu0 %v13125_v0  ;;  %v6600_v43 = vpop.permute.xlu0 %6599 }
 0x159   : > { %12490 = vmatprep.mubr.msk.f32.mxu1 %vm13126_vm0, %v13125_v0  ;;  %12494 = vmatpush3.msk.msra.mxu0 %vm327_vm1, %v5691_v27  ;;  %v14434_v27 = vld [vmem:[%s15021_s1 + $0x38] sm:$0xff] }
 0x15a   : > { %12495 = vmatprep.mubr.msk.f32.mxu0 %vm13126_vm0, %v13125_v0  ;;  %10069 = vrot.lane.b32.xlu0 %v13926_v8, %s13128_s13 }
 0x15b   : > { %12491 = vmatmul.mubr.msk.f32.vlgmr.msra.gmra.mrb[70].mxu1 %vm323_vm2, %v14030_v24  ;;  %12496 = vmatmul.mubr.msk.f32.vlgmr.msra.gmra.mrb[72].mxu0 %vm323_vm2, %v14030_v24  ;;  %v6822_v47 = vpop.permute.xlu1 %6821 }
 0x15c   : > { %12498 = vmatprep.subr.mxu1 %v13125_v0  ;;  %10143 = vrot.lane.b32.xlu1 %v13936_v10, %s13128_s13  ;;  %v6748_v46 = vpop.permute.xlu0 %6747 }
 0x15d   : > { %12499 = vmatpush3.msk.msra.mxu1 %vm327_vm1, %v5765_v30  ;;  %12503 = vmatprep.subr.mxu0 %v13125_v0 }
 0x15e   : > { %12500 = vmatprep.mubr.msk.f32.mxu1 %vm13126_vm0, %v13125_v0  ;;  %12504 = vmatpush3.msk.msra.mxu0 %vm327_vm1, %v5839_v32 }
 0x15f   : > { %12505 = vmatprep.mubr.msk.f32.mxu0 %vm13126_vm0, %v13125_v0  ;;  %10217 = vrot.lane.b32.xlu0 %v13950_v12, %s13128_s13  ;;  %v6970_v49 = vpop.permute.xlu1 %6969 }
 0x160   : > { %12501 = vmatmul.mubr.msk.f32.vlgmr.msra.gmra.mrb[72].mxu1 %vm323_vm2, %v14030_v24  ;;  %12506 = vmatmul.mubr.msk.f32.vlgmr.msra.gmra.mrb[74].mxu0 %vm323_vm2, %v14030_v24  ;;  %v6896_v48 = vpop.permute.xlu0 %6895 }
 0x161   : > { %12508 = vmatprep.subr.mxu1 %v13125_v0  ;;  %10291 = vrot.lane.b32.xlu1 %v13960_v14, %s13128_s13 }
 0x162   : > { %12509 = vmatpush3.msk.msra.mxu1 %vm327_vm1, %v5913_v34  ;;  %12513 = vmatprep.subr.mxu0 %v13125_v0 }
 0x163   : > { %12510 = vmatprep.mubr.msk.f32.mxu1 %vm13126_vm0, %v13125_v0  ;;  %12514 = vmatpush3.msk.msra.mxu0 %vm327_vm1, %v5987_v35  ;;  %v7118_v51 = vpop.permute.xlu1 %7117 }
 0x164   : > { %12515 = vmatprep.mubr.msk.f32.mxu0 %vm13126_vm0, %v13125_v0  ;;  %10365 = vrot.lane.b32.xlu0 %v13974_v16, %s13128_s13  ;;  %v7044_v50 = vpop.permute.xlu0 %7043 }
 0x165   : > { %12511 = vmatmul.mubr.msk.f32.vlgmr.msra.gmra.mrb[74].mxu1 %vm323_vm2, %v14030_v24  ;;  %12516 = vmatmul.mubr.msk.f32.vlgmr.msra.gmra.mrb[76].mxu0 %vm323_vm2, %v14030_v24 }
 0x166   : > { %12518 = vmatprep.subr.mxu1 %v13125_v0  ;;  %10439 = vrot.lane.b32.xlu1 %v13984_v17, %s13128_s13 }
 0x167   : > { %12519 = vmatpush3.msk.msra.mxu1 %vm327_vm1, %v6061_v36  ;;  %12523 = vmatprep.subr.mxu0 %v13125_v0 }
 0x168   : > { %12520 = vmatprep.mubr.msk.f32.mxu1 %vm13126_vm0, %v13125_v0  ;;  %12524 = vmatpush3.msk.msra.mxu0 %vm327_vm1, %v6135_v37 }
 0x169   : > { %12525 = vmatprep.mubr.msk.f32.mxu0 %vm13126_vm0, %v13125_v0  ;;  %10513 = vrot.lane.b32.xlu0 %v13998_v19, %s13128_s13 }
 0x16a   : > { %12521 = vmatmul.mubr.msk.f32.vlgmr.msra.gmra.mrb[76].mxu1 %vm323_vm2, %v14030_v24  ;;  %12526 = vmatmul.mubr.msk.f32.vlgmr.msra.gmra.mrb[78].mxu0 %vm323_vm2, %v14030_v24 }
 0x16b   : > { %12528 = vmatprep.subr.mxu1 %v13125_v0  ;;  %10587 = vrot.lane.b32.xlu1 %v14008_v21, %s13128_s13 }
 0x16c   : > { %12529 = vmatpush3.msk.msra.mxu1 %vm327_vm1, %v6209_v38  ;;  %12533 = vmatprep.subr.mxu0 %v13125_v0 }
 0x16d   : > { %12530 = vmatprep.mubr.msk.f32.mxu1 %vm13126_vm0, %v13125_v0  ;;  %12534 = vmatpush3.msk.msra.mxu0 %vm327_vm1, %v6301_v39 }
 0x16e   : > { %12535 = vmatprep.mubr.msk.f32.mxu0 %vm13126_vm0, %v13125_v0  ;;  %10661 = vrot.lane.b32.xlu0 %v14022_v23, %s13128_s13 }
 0x16f   : > { %12531 = vmatmul.mubr.msk.f32.vlgmr.msra.gmra.mrb[78].mxu1 %vm323_vm2, %v14030_v24  ;;  %12536 = vmatmul.mubr.msk.f32.vlgmr.msra.gmra.mrb[80].mxu0 %vm323_vm2, %v14178_v44 }
 0x170   : > { %12538 = vmatprep.subr.mxu1 %v13125_v0  ;;  %10735 = vrot.lane.b32.xlu1 %v14036_v26, %s13128_s13 }
 0x171   : > { %12539 = vmatpush3.msk.msra.mxu1 %vm327_vm1, %v6378_v40  ;;  %12543 = vmatprep.subr.mxu0 %v13125_v0 }
 0x172   : > { %12540 = vmatprep.mubr.msk.f32.mxu1 %vm13126_vm0, %v13125_v0  ;;  %12544 = vmatpush3.msk.msra.mxu0 %vm327_vm1, %v6452_v41 }
 0x173   : > { %12545 = vmatprep.mubr.msk.f32.mxu0 %vm13126_vm0, %v13125_v0  ;;  %10809 = vrot.lane.b32.xlu0 %v14050_v28, %s13128_s13 }
 0x174   : > { %12541 = vmatmul.mubr.msk.f32.vlgmr.msra.gmra.mrb[80].mxu1 %vm323_vm2, %v14178_v44  ;;  %12546 = vmatmul.mubr.msk.f32.vlgmr.msra.gmra.mrb[82].mxu0 %vm323_vm2, %v14178_v44 }
 0x175   : > { %12548 = vmatprep.subr.mxu1 %v13125_v0  ;;  %10883 = vrot.lane.b32.xlu1 %v14058_v29, %s13128_s13  ;;  %v7192_v52 = vpop.permute.xlu0 %7191 }
 0x176   : > { %12549 = vmatpush3.msk.msra.mxu1 %vm327_vm1, %v6526_v42  ;;  %12553 = vmatprep.subr.mxu0 %v13125_v0 }
 0x177   : > { %12550 = vmatprep.mubr.msk.f32.mxu1 %vm13126_vm0, %v13125_v0  ;;  %12554 = vmatpush3.msk.msra.mxu0 %vm327_vm1, %v6600_v43  ;;  %v7266_v53 = vpop.permute.xlu1 %7265 }
 0x178   : > { %12555 = vmatprep.mubr.msk.f32.mxu0 %vm13126_vm0, %v13125_v0  ;;  %10957 = vrot.lane.b32.xlu0 %v14072_v31, %s13128_s13 }
 0x179   : > { %12551 = vmatmul.mubr.msk.f32.vlgmr.msra.gmra.mrb[82].mxu1 %vm323_vm2, %v14178_v44  ;;  %12556 = vmatmul.mubr.msk.f32.vlgmr.msra.gmra.mrb[84].mxu0 %vm323_vm2, %v14178_v44 }
 0x17a   : > { %12558 = vmatprep.subr.mxu1 %v13125_v0  ;;  %11031 = vrot.lane.b32.xlu1 %v14080_v33, %s13128_s13  ;;  %v7340_v54 = vpop.permute.xlu0 %7339  ;;  %s11313_s13 = sadd.s32 %s11838_s12, %s11837_s6 }
 0x17b   : > { %12559 = vmatpush3.msk.msra.mxu1 %vm327_vm1, %v6674_v45  ;;  %12563 = vmatprep.subr.mxu0 %v13125_v0  ;;  %s11839_s9 = sshll.u32 %s11313_s13, 7 }
 0x17c   : > { %12560 = vmatprep.mubr.msk.f32.mxu1 %vm13126_vm0, %v13125_v0  ;;  %12564 = vmatpush3.msk.msra.mxu0 %vm327_vm1, %v6748_v46  ;;  %v7414_v55 = vpop.permute.xlu1 %7413  ;;  %s14945_s14 = scalar_lea.hbm %s15023_s3, %s11839_s9 }
 0x17d   : > { %12565 = vmatprep.mubr.msk.f32.mxu0 %vm13126_vm0, %v13125_v0  ;;  %12561 = vmatmul.mubr.msk.f32.vlgmr.msra.gmra.mrb[84].mxu1 %vm323_vm2, %v14178_v44 }
 0x17e   : > { %12566 = vmatmul.mubr.msk.f32.vlgmr.msra.gmra.mrb[86].mxu0 %vm323_vm2, %v14178_v44  ;;  %12568 = vmatprep.subr.mxu1 %v13125_v0 }
 0x17f   : > { %12569 = vmatpush3.msk.msra.mxu1 %vm327_vm1, %v6822_v47  ;;  %12573 = vmatprep.subr.mxu0 %v13125_v0 }
 0x180   : > { %12570 = vmatprep.mubr.msk.f32.mxu1 %vm13126_vm0, %v13125_v0  ;;  %12574 = vmatpush3.msk.msra.mxu0 %vm327_vm1, %v6896_v48 }
 0x181   : > { %12575 = vmatprep.mubr.msk.f32.mxu0 %vm13126_vm0, %v13125_v0  ;;  %12571 = vmatmul.mubr.msk.f32.vlgmr.msra.gmra.mrb[86].mxu1 %vm323_vm2, %v14178_v44 }
 0x182   : > { %12576 = vmatmul.mubr.msk.f32.vlgmr.msra.gmra.mrb[88].mxu0 %vm323_vm2, %v14178_v44  ;;  %12578 = vmatprep.subr.mxu1 %v13125_v0 }
 0x183   : > { %12579 = vmatpush3.msk.msra.mxu1 %vm327_vm1, %v6970_v49  ;;  %12583 = vmatprep.subr.mxu0 %v13125_v0 }
 0x184   : > { %12580 = vmatprep.mubr.msk.f32.mxu1 %vm13126_vm0, %v13125_v0  ;;  %12584 = vmatpush3.msk.msra.mxu0 %vm327_vm1, %v7044_v50 }
 0x185   : > { %12585 = vmatprep.mubr.msk.f32.mxu0 %vm13126_vm0, %v13125_v0  ;;  %12581 = vmatmul.mubr.msk.f32.vlgmr.msra.gmra.mrb[88].mxu1 %vm323_vm2, %v14178_v44 }
 0x186   : > { %12586 = vmatmul.mubr.msk.f32.vlgmr.msra.gmra.mrb[90].mxu0 %vm323_vm2, %v14178_v44  ;;  %12588 = vmatprep.subr.mxu1 %v13125_v0 }
 0x187   : > { %12589 = vmatpush3.msk.msra.mxu1 %vm327_vm1, %v7118_v51  ;;  %12593 = vmatprep.subr.mxu0 %v13125_v0 }
 0x188   : > { %12590 = vmatprep.mubr.msk.f32.mxu1 %vm13126_vm0, %v13125_v0  ;;  %12594 = vmatpush3.msk.msra.mxu0 %vm327_vm1, %v7192_v52 }
 0x189   : > { %12595 = vmatprep.mubr.msk.f32.mxu0 %vm13126_vm0, %v13125_v0  ;;  %12591 = vmatmul.mubr.msk.f32.vlgmr.msra.gmra.mrb[90].mxu1 %vm323_vm2, %v14178_v44 }
 0x18a   : > { %12596 = vmatmul.mubr.msk.f32.vlgmr.msra.gmra.mrb[92].mxu0 %vm323_vm2, %v14178_v44  ;;  %12598 = vmatprep.subr.mxu1 %v13125_v0 }
 0x18b   : > { %12599 = vmatpush3.msk.msra.mxu1 %vm327_vm1, %v7266_v53  ;;  %12603 = vmatprep.subr.mxu0 %v13125_v0 }
 0x18c   : > { %12600 = vmatprep.mubr.msk.f32.mxu1 %vm13126_vm0, %v13125_v0  ;;  %12604 = vmatpush3.msk.msra.mxu0 %vm327_vm1, %v7340_v54 }
 0x18d   : > { %12605 = vmatprep.mubr.msk.f32.mxu0 %vm13126_vm0, %v13125_v0  ;;  %12601 = vmatmul.mubr.msk.f32.vlgmr.msra.gmra.mrb[92].mxu1 %vm323_vm2, %v14178_v44 }
 0x18e   : > { %12606 = vmatmul.mubr.msk.f32.vlgmr.msra.gmra.mrb[94].mxu0 %vm323_vm2, %v14178_v44  ;;  %12608 = vmatprep.subr.mxu1 %v13125_v0 }
 0x18f   : > { %12609 = vmatpush3.msk.msra.mxu1 %vm327_vm1, %v7414_v55  ;;  %12613 = vmatprep.subr.mxu0 %v13125_v0 }
 0x190   : > { %12610 = vmatprep.mubr.msk.f32.mxu1 %vm13126_vm0, %v13125_v0  ;;  %12614 = vmatpush3.msk.msra.mxu0 %vm327_vm1, %v13902_v6 }
 0x191   : > { %12615 = vmatprep.mubr.msk.f32.mxu0 %vm13126_vm0, %v13125_v0  ;;  %12611 = vmatmul.mubr.msk.f32.vlgmr.msra.gmra.mrb[94].mxu1 %vm323_vm2, %v14178_v44 }
 0x192   : > { %12616 = vmatmul.mubr.msk.f32.vlgmr.msra.gmra.mrb[96].mxu0 %vm323_vm2, %v14291_v56  ;;  %12618 = vmatprep.subr.mxu1 %v13125_v0 }
 0x193   : > { %12619 = vmatpush3.msk.msra.mxu1 %vm327_vm1, %v13912_v7  ;;  %12623 = vmatprep.subr.mxu0 %v13125_v0  ;;  %v14307_v57 = vpop.f32.mrb[0].mxu0 }
 0x194   : > { %12620 = vmatprep.mubr.msk.f32.mxu1 %vm13126_vm0, %v13125_v0  ;;  %12624 = vmatpush3.msk.msra.mxu0 %vm327_vm1, %v13926_v8  ;;  %v12137_v58 = vpop.f32.mrb[1].mxu0 }
 0x195   : > { %12625 = vmatprep.mubr.msk.f32.mxu0 %vm13126_vm0, %v13125_v0  ;;  %12621 = vmatmul.mubr.msk.f32.vlgmr.msra.gmra.mrb[96].mxu1 %vm323_vm2, %v14291_v56 }
 0x196   : > { %12626 = vmatmul.mubr.msk.f32.vlgmr.msra.gmra.mrb[98].mxu0 %vm323_vm2, %v14291_v56  ;;  %12628 = vmatprep.subr.mxu1 %v13125_v0 }
 0x197   : > { %12629 = vmatpush3.msk.msra.mxu1 %vm327_vm1, %v13936_v10  ;;  %12633 = vmatprep.subr.mxu0 %v13125_v0  ;;  %v14323_v59 = vpop.f32.mrb[0].mxu1  ;;  %v14325_v60 = vpop.f32.mrb[2].mxu0 }
 0x198   : > { %12630 = vmatprep.mubr.msk.f32.mxu1 %vm13126_vm0, %v13125_v0  ;;  %12634 = vmatpush3.msk.msra.mxu0 %vm327_vm1, %v13950_v12  ;;  %v12142_v61 = vpop.f32.mrb[1].mxu1  ;;  %v12147_v62 = vpop.f32.mrb[3].mxu0 }
 0x199   : > { %12635 = vmatprep.mubr.msk.f32.mxu0 %vm13126_vm0, %v13125_v0  ;;  %12631 = vmatmul.mubr.msk.f32.vlgmr.msra.gmra.mrb[98].mxu1 %vm323_vm2, %v14291_v56 }
 0x19a   : > { %12636 = vmatmul.mubr.msk.f32.vlgmr.msra.gmra.mrb[100].mxu0 %vm323_vm2, %v14291_v56  ;;  %12638 = vmatprep.subr.mxu1 %v13125_v0 }
 0x19b   : > { %12639 = vmatpush3.msk.msra.mxu1 %vm327_vm1, %v13960_v14  ;;  %12643 = vmatprep.subr.mxu0 %v13125_v0  ;;  %v14341_v63 = vpop.f32.mrb[2].mxu1  ;;  %v14343_v1 = vpop.f32.mrb[4].mxu0 }
 0x19c   : > { %12640 = vmatprep.mubr.msk.f32.mxu1 %vm13126_vm0, %v13125_v0  ;;  %12644 = vmatpush3.msk.msra.mxu0 %vm327_vm1, %v13974_v16  ;;  %v12152_v2 = vpop.f32.mrb[3].mxu1  ;;  %v12157_v3 = vpop.f32.mrb[5].mxu0 }
 0x19d   : > { %12645 = vmatprep.mubr.msk.f32.mxu0 %vm13126_vm0, %v13125_v0  ;;  %12641 = vmatmul.mubr.msk.f32.vlgmr.msra.gmra.mrb[100].mxu1 %vm323_vm2, %v14291_v56 }
 0x19e   : > { %12646 = vmatmul.mubr.msk.f32.vlgmr.msra.gmra.mrb[102].mxu0 %vm323_vm2, %v14291_v56  ;;  %12648 = vmatprep.subr.mxu1 %v13125_v0 }
 0x19f   : > { %12649 = vmatpush3.msk.msra.mxu1 %vm327_vm1, %v13984_v17  ;;  %12653 = vmatprep.subr.mxu0 %v13125_v0  ;;  %v8714_v4 = vpop.permute.xlu0 %8713  ;;  %v14359_v5 = vpop.f32.mrb[4].mxu1 }
 0x1a0   : > { %12650 = vmatprep.mubr.msk.f32.mxu1 %vm13126_vm0, %v13125_v0  ;;  %12654 = vmatpush3.msk.msra.mxu0 %vm327_vm1, %v13998_v19  ;;  %v12162_v6 = vpop.f32.mrb[5].mxu1  ;;  %v14365_v7 = vpop.f32.mrb[6].mxu0 }
 0x1a1   : > { %12655 = vmatprep.mubr.msk.f32.mxu0 %vm13126_vm0, %v13125_v0  ;;  %12651 = vmatmul.mubr.msk.f32.vlgmr.msra.gmra.mrb[102].mxu1 %vm323_vm2, %v14291_v56  ;;  %v8791_v8 = vpop.permute.xlu1 %8790  ;;  %v12167_v9 = vpop.f32.mrb[7].mxu0 }
 0x1a2   : > { %12656 = vmatmul.mubr.msk.f32.vlgmr.msra.gmra.mrb[104].mxu0 %vm323_vm2, %v14291_v56  ;;  %12658 = vmatprep.subr.mxu1 %v13125_v0 }
 0x1a3   : > { %12659 = vmatpush3.msk.msra.mxu1 %vm327_vm1, %v14008_v21  ;;  %12663 = vmatprep.subr.mxu0 %v13125_v0  ;;  %v14377_v10 = vpop.f32.mrb[6].mxu1  ;;  %v14379_v11 = vpop.f32.mrb[8].mxu0 }
 0x1a4   : > { %12660 = vmatprep.mubr.msk.f32.mxu1 %vm13126_vm0, %v13125_v0  ;;  %12664 = vmatpush3.msk.msra.mxu0 %vm327_vm1, %v14022_v23  ;;  %v8865_v12 = vpop.permute.xlu0 %8864  ;;  %v12172_v13 = vpop.f32.mrb[7].mxu1 }
 0x1a5   : > { %12665 = vmatprep.mubr.msk.f32.mxu0 %vm13126_vm0, %v13125_v0  ;;  %12661 = vmatmul.mubr.msk.f32.vlgmr.msra.gmra.mrb[104].mxu1 %vm323_vm2, %v14291_v56  ;;  %v12177_v14 = vpop.f32.mrb[9].mxu0 }
 0x1a6   : > { %12666 = vmatmul.mubr.msk.f32.vlgmr.msra.gmra.mrb[106].mxu0 %vm323_vm2, %v14291_v56  ;;  %12668 = vmatprep.subr.mxu1 %v13125_v0  ;;  %v8939_v15 = vpop.permute.xlu1 %8938 }
 0x1a7   : > { %12669 = vmatpush3.msk.msra.mxu1 %vm327_vm1, %v14036_v26  ;;  %12673 = vmatprep.subr.mxu0 %v13125_v0  ;;  %v14395_v16 = vpop.f32.mrb[8].mxu1  ;;  %v14397_v17 = vpop.f32.mrb[10].mxu0 }
 0x1a8   : > { %12670 = vmatprep.mubr.msk.f32.mxu1 %vm13126_vm0, %v13125_v0  ;;  %12674 = vmatpush3.msk.msra.mxu0 %vm327_vm1, %v14050_v28  ;;  %v12182_v18 = vpop.f32.mrb[9].mxu1  ;;  %v12187_v19 = vpop.f32.mrb[11].mxu0 }
 0x1a9   : > { %12675 = vmatprep.mubr.msk.f32.mxu0 %vm13126_vm0, %v13125_v0  ;;  %12671 = vmatmul.mubr.msk.f32.vlgmr.msra.gmra.mrb[106].mxu1 %vm323_vm2, %v14291_v56  ;;  %v9013_v20 = vpop.permute.xlu0 %9012 }
 0x1aa   : > { %12676 = vmatmul.mubr.msk.f32.vlgmr.msra.gmra.mrb[108].mxu0 %vm323_vm2, %v14291_v56  ;;  %12678 = vmatprep.subr.mxu1 %v13125_v0 }
 0x1ab   : > { %12679 = vmatpush3.msk.msra.mxu1 %vm327_vm1, %v14058_v29  ;;  %12683 = vmatprep.subr.mxu0 %v13125_v0  ;;  %v9087_v21 = vpop.permute.xlu1 %9086  ;;  %v14413_v22 = vpop.f32.mrb[10].mxu1 }
 0x1ac   : > { %12680 = vmatprep.mubr.msk.f32.mxu1 %vm13126_vm0, %v13125_v0  ;;  %12684 = vmatpush3.msk.msra.mxu0 %vm327_vm1, %v14072_v31  ;;  %v12192_v23 = vpop.f32.mrb[11].mxu1  ;;  %v14419_v24 = vpop.f32.mrb[12].mxu0 }
 0x1ad   : > { %12685 = vmatprep.mubr.msk.f32.mxu0 %vm13126_vm0, %v13125_v0  ;;  %12681 = vmatmul.mubr.msk.f32.vlgmr.msra.gmra.mrb[108].mxu1 %vm323_vm2, %v14291_v56  ;;  %v12197_v25 = vpop.f32.mrb[13].mxu0 }
 0x1ae   : > { %12686 = vmatmul.mubr.msk.f32.vlgmr.msra.gmra.mrb[110].mxu0 %vm323_vm2, %v14291_v56  ;;  %12688 = vmatprep.subr.mxu1 %v13125_v0  ;;  %v9161_v26 = vpop.permute.xlu0 %9160 }
 0x1af   : > { %12689 = vmatpush3.msk.msra.mxu1 %vm327_vm1, %v14080_v33  ;;  %12693 = vmatprep.subr.mxu0 %v13125_v0  ;;  %v14436_v28 = vpop.f32.mrb[12].mxu1  ;;  %v14438_v29 = vpop.f32.mrb[14].mxu0 }
 0x1b0   : > { %12690 = vmatprep.mubr.msk.f32.mxu1 %vm13126_vm0, %v13125_v0  ;;  %12694 = vmatpush3.msk.msra.mxu0 %vm327_vm1, %v8714_v4  ;;  %v9235_v30 = vpop.permute.xlu1 %9234  ;;  %v12202_v31 = vpop.f32.mrb[13].mxu1 }
 0x1b1   : > { %12695 = vmatprep.mubr.msk.f32.mxu0 %vm13126_vm0, %v13125_v0  ;;  %12691 = vmatmul.mubr.msk.f32.vlgmr.msra.gmra.mrb[110].mxu1 %vm323_vm2, %v14291_v56  ;;  %v12207_v32 = vpop.f32.mrb[15].mxu0 }
 0x1b2   : > { %12696 = vmatmul.mubr.msk.f32.vlgmr.msra.gmra.mrb[112].mxu0 %vm323_vm2, %v14434_v27  ;;  %12698 = vmatprep.subr.mxu1 %v13125_v0 }
 0x1b3   : > { %12699 = vmatpush3.msk.msra.mxu1 %vm327_vm1, %v8791_v8  ;;  %12703 = vmatprep.subr.mxu0 %v13125_v0  ;;  %v9309_v33 = vpop.permute.xlu0 %9308  ;;  %v14452_v34 = vpop.f32.mrb[14].mxu1 }
 0x1b4   : > { %12700 = vmatprep.mubr.msk.f32.mxu1 %vm13126_vm0, %v13125_v0  ;;  %12704 = vmatpush3.msk.msra.mxu0 %vm327_vm1, %v8865_v12  ;;  %v1596_v35 = vpop.f32.mrb[16].mxu0  ;;  %v12212_v36 = vpop.f32.mrb[15].mxu1 }
 0x1b5   : > { %12705 = vmatprep.mubr.msk.f32.mxu0 %vm13126_vm0, %v13125_v0  ;;  %12701 = vmatmul.mubr.msk.f32.vlgmr.msra.gmra.mrb[112].mxu1 %vm323_vm2, %v14434_v27  ;;  %v9383_v37 = vpop.permute.xlu1 %9382  ;;  %v14462_v38 = vadd.f32 %v1596_v35, %v14307_v57  ;;  %v12217_v39 = vpop.f32.mrb[17].mxu0 }
 0x1b6   : > { %12706 = vmatmul.mubr.msk.f32.vlgmr.msra.gmra.mrb[114].mxu0 %vm323_vm2, %v14434_v27  ;;  %12708 = vmatprep.subr.mxu1 %v13125_v0 }
 0x1b7   : > { %12709 = vmatpush3.msk.msra.mxu1 %vm327_vm1, %v8939_v15  ;;  %12713 = vmatprep.subr.mxu0 %v13125_v0  ;;  %v1668_v40 = vpop.f32.mrb[16].mxu1  ;;  %v1740_v41 = vpop.f32.mrb[18].mxu0 }
 0x1b8   : > { %12710 = vmatprep.mubr.msk.f32.mxu1 %vm13126_vm0, %v13125_v0  ;;  %12714 = vmatpush3.msk.msra.mxu0 %vm327_vm1, %v9013_v20  ;;  %v9457_v42 = vpop.permute.xlu0 %9456  ;;  %v14473_v43 = vadd.f32 %v1668_v40, %v14323_v59  ;;  %v14476_v44 = vadd.f32 %v1740_v41, %v14325_v60  ;;  %v12222_v45 = vpop.f32.mrb[17].mxu1 }
 0x1b9   : > { %12715 = vmatprep.mubr.msk.f32.mxu0 %vm13126_vm0, %v13125_v0  ;;  %12711 = vmatmul.mubr.msk.f32.vlgmr.msra.gmra.mrb[114].mxu1 %vm323_vm2, %v14434_v27  ;;  %v12227_v46 = vpop.f32.mrb[19].mxu0 }
 0x1ba   : > { %12716 = vmatmul.mubr.msk.f32.vlgmr.msra.gmra.mrb[116].mxu0 %vm323_vm2, %v14434_v27  ;;  %12718 = vmatprep.subr.mxu1 %v13125_v0  ;;  %v9531_v47 = vpop.permute.xlu1 %9530 }
 0x1bb   : > { %12719 = vmatpush3.msk.msra.mxu1 %vm327_vm1, %v9087_v21  ;;  %12723 = vmatprep.subr.mxu0 %v13125_v0  ;;  %v1812_v48 = vpop.f32.mrb[18].mxu1  ;;  %v1884_v49 = vpop.f32.mrb[20].mxu0 }
 0x1bc   : > { %12720 = vmatprep.mubr.msk.f32.mxu1 %vm13126_vm0, %v13125_v0  ;;  %12724 = vmatpush3.msk.msra.mxu0 %vm327_vm1, %v9161_v26  ;;  %v14491_v50 = vadd.f32 %v1812_v48, %v14341_v63  ;;  %v14494_v51 = vadd.f32 %v1884_v49, %v14343_v1  ;;  %v12232_v52 = vpop.f32.mrb[19].mxu1  ;;  %v12237_v53 = vpop.f32.mrb[21].mxu0 }
 0x1bd   : > { %12725 = vmatprep.mubr.msk.f32.mxu0 %vm13126_vm0, %v13125_v0  ;;  %12721 = vmatmul.mubr.msk.f32.vlgmr.msra.gmra.mrb[116].mxu1 %vm323_vm2, %v14434_v27  ;;  %v9605_v54 = vpop.permute.xlu0 %9604 }
 0x1be   : > { %12726 = vmatmul.mubr.msk.f32.vlgmr.msra.gmra.mrb[118].mxu0 %vm323_vm2, %v14434_v27  ;;  %12728 = vmatprep.subr.mxu1 %v13125_v0 }
 0x1bf   : > { %12729 = vmatpush3.msk.msra.mxu1 %vm327_vm1, %v9235_v30  ;;  %12733 = vmatprep.subr.mxu0 %v13125_v0  ;;  %v9679_v55 = vpop.permute.xlu1 %9678  ;;  %v1956_v56 = vpop.f32.mrb[20].mxu1 }
 0x1c0   : > { %12730 = vmatprep.mubr.msk.f32.mxu1 %vm13126_vm0, %v13125_v0  ;;  %12734 = vmatpush3.msk.msra.mxu0 %vm327_vm1, %v9309_v33  ;;  %v14509_v57 = vadd.f32 %v1956_v56, %v14359_v5  ;;  %v2028_v58 = vpop.f32.mrb[22].mxu0  ;;  %v12242_v59 = vpop.f32.mrb[21].mxu1 }
 0x1c1   : > { %12735 = vmatprep.mubr.msk.f32.mxu0 %vm13126_vm0, %v13125_v0  ;;  %12731 = vmatmul.mubr.msk.f32.vlgmr.msra.gmra.mrb[118].mxu1 %vm323_vm2, %v14434_v27  ;;  %v14516_v60 = vadd.f32 %v2028_v58, %v14365_v7  ;;  %v12247_v61 = vpop.f32.mrb[23].mxu0 }
 0x1c2   : > { %12736 = vmatmul.mubr.msk.f32.vlgmr.msra.gmra.mrb[120].mxu0 %vm323_vm2, %v14434_v27  ;;  %12738 = vmatprep.subr.mxu1 %v13125_v0  ;;  %v9753_v62 = vpop.permute.xlu0 %9752 }
 0x1c3   : > { %12739 = vmatpush3.msk.msra.mxu1 %vm327_vm1, %v9383_v37  ;;  %12743 = vmatprep.subr.mxu0 %v13125_v0  ;;  %v2100_v63 = vpop.f32.mrb[22].mxu1  ;;  %v2172_v1 = vpop.f32.mrb[24].mxu0 }
 0x1c4   : > { %12740 = vmatprep.mubr.msk.f32.mxu1 %vm13126_vm0, %v13125_v0  ;;  %12744 = vmatpush3.msk.msra.mxu0 %vm327_vm1, %v9457_v42  ;;  %v9827_v2 = vpop.permute.xlu1 %9826  ;;  %v14527_v3 = vadd.f32 %v2100_v63, %v14377_v10  ;;  %v14530_v4 = vadd.f32 %v2172_v1, %v14379_v11  ;;  %v12252_v5 = vpop.f32.mrb[23].mxu1 }
 0x1c5   : > { %12745 = vmatprep.mubr.msk.f32.mxu0 %vm13126_vm0, %v13125_v0  ;;  %12741 = vmatmul.mubr.msk.f32.vlgmr.msra.gmra.mrb[120].mxu1 %vm323_vm2, %v14434_v27  ;;  %v12257_v6 = vpop.f32.mrb[25].mxu0 }
 0x1c6   : > { %12746 = vmatmul.mubr.msk.f32.vlgmr.msra.gmra.mrb[122].mxu0 %vm323_vm2, %v14434_v27  ;;  %12748 = vmatprep.subr.mxu1 %v13125_v0 }
 0x1c7   : > { %12749 = vmatpush3.msk.msra.mxu1 %vm327_vm1, %v9531_v47  ;;  %12753 = vmatprep.subr.mxu0 %v13125_v0  ;;  %v9919_v7 = vpop.permute.xlu0 %9918  ;;  %v2244_v8 = vpop.f32.mrb[24].mxu1 }
 0x1c8   : > { %12750 = vmatprep.mubr.msk.f32.mxu1 %vm13126_vm0, %v13125_v0  ;;  %12754 = vmatpush3.msk.msra.mxu0 %vm327_vm1, %v9605_v54  ;;  %v14545_v9 = vadd.f32 %v2244_v8, %v14395_v16  ;;  %v2316_v10 = vpop.f32.mrb[26].mxu0  ;;  %v12262_v11 = vpop.f32.mrb[25].mxu1 }
 0x1c9   : > { %12755 = vmatprep.mubr.msk.f32.mxu0 %vm13126_vm0, %v13125_v0  ;;  %12751 = vmatmul.mubr.msk.f32.vlgmr.msra.gmra.mrb[122].mxu1 %vm323_vm2, %v14434_v27  ;;  %v9996_v12 = vpop.permute.xlu1 %9995  ;;  %v14552_v13 = vadd.f32 %v2316_v10, %v14397_v17  ;;  %v12267_v14 = vpop.f32.mrb[27].mxu0 }
 0x1ca   : > { %12756 = vmatmul.mubr.msk.f32.vlgmr.msra.gmra.mrb[124].mxu0 %vm323_vm2, %v14434_v27  ;;  %12758 = vmatprep.subr.mxu1 %v13125_v0 }
 0x1cb   : > { %12759 = vmatpush3.msk.msra.mxu1 %vm327_vm1, %v9679_v55  ;;  %12763 = vmatprep.subr.mxu0 %v13125_v0  ;;  %v2388_v15 = vpop.f32.mrb[26].mxu1  ;;  %v2460_v16 = vpop.f32.mrb[28].mxu0 }
 0x1cc   : > { %12760 = vmatprep.mubr.msk.f32.mxu1 %vm13126_vm0, %v13125_v0  ;;  %12764 = vmatpush3.msk.msra.mxu0 %vm327_vm1, %v9753_v62  ;;  %v10070_v18 = vpop.permute.xlu0 %10069  ;;  %v14563_v17 = vadd.f32 %v2388_v15, %v14413_v22  ;;  %v14566_v19 = vadd.f32 %v2460_v16, %v14419_v24  ;;  %v12272_v20 = vpop.f32.mrb[27].mxu1  ;;  %v14580_v22 = vld [vmem:[%s15021_s1 + $0x40] sm:$0xff] }
 0x1cd   : > { %12765 = vmatprep.mubr.msk.f32.mxu0 %vm13126_vm0, %v13125_v0  ;;  %12761 = vmatmul.mubr.msk.f32.vlgmr.msra.gmra.mrb[124].mxu1 %vm323_vm2, %v14434_v27  ;;  %v12277_v21 = vpop.f32.mrb[29].mxu0 }
 0x1ce   : > { %12766 = vmatmul.mubr.msk.f32.vlgmr.msra.gmra.mrb[126].mxu0 %vm323_vm2, %v14434_v27  ;;  %12768 = vmatprep.subr.mxu1 %v13125_v0  ;;  %v10144_v23 = vpop.permute.xlu1 %10143 }
 0x1cf   : > { %12769 = vmatpush3.msk.msra.mxu1 %vm327_vm1, %v9827_v2  ;;  %12773 = vmatprep.subr.mxu0 %v13125_v0  ;;  %v2532_v24 = vpop.f32.mrb[28].mxu1  ;;  %v2604_v25 = vpop.f32.mrb[30].mxu0 }
 0x1d0   : > { %12770 = vmatprep.mubr.msk.f32.mxu1 %vm13126_vm0, %v13125_v0  ;;  %12774 = vmatpush3.msk.msra.mxu0 %vm327_vm1, %v9919_v7  ;;  %v14586_v26 = vadd.f32 %v2532_v24, %v14436_v28  ;;  %v14589_v30 = vadd.f32 %v2604_v25, %v14438_v29  ;;  %v12282_v31 = vpop.f32.mrb[29].mxu1  ;;  %v12287_v32 = vpop.f32.mrb[31].mxu0  ;;  %v11121_v24 = vld [vmem:[%s15022_s2] sm:$0xff]  ;;  %v13129_v25 = vmov 0  }
 0x1d1   : > { %12775 = vmatprep.mubr.msk.f32.mxu0 %vm13126_vm0, %v13125_v0  ;;  %12771 = vmatmul.mubr.msk.f32.vlgmr.msra.gmra.mrb[126].mxu1 %vm323_vm2, %v14434_v27  ;;  %v10218_v33 = vpop.permute.xlu0 %10217 }
 0x1d2   : > { %12776 = vmatmul.mubr.msk.f32.vlgmr.msra.gmra.mrb[128].mxu0 %vm323_vm2, %v14580_v22  ;;  %12778 = vmatprep.subr.mxu1 %v13125_v0 }
 0x1d3   : > { %12779 = vmatpush3.msk.msra.mxu1 %vm327_vm1, %v9996_v12  ;;  %12783 = vmatprep.subr.mxu0 %v13125_v0  ;;  %v10292_v28 = vpop.permute.xlu1 %10291  ;;  %v2676_v29 = vpop.f32.mrb[30].mxu1 }
 0x1d4   : > { %12780 = vmatprep.mubr.msk.f32.mxu1 %vm13126_vm0, %v13125_v0  ;;  %12784 = vmatpush3.msk.msra.mxu0 %vm327_vm1, %v10070_v18  ;;  %v14604_v35 = vadd.f32 %v2676_v29, %v14452_v34  ;;  %v2755_v27 = vpop.f32.mrb[32].mxu0  ;;  %v12292_v36 = vpop.f32.mrb[31].mxu1 }
 0x1d5   : > { %12785 = vmatprep.mubr.msk.f32.mxu0 %vm13126_vm0, %v13125_v0  ;;  %12781 = vmatmul.mubr.msk.f32.vlgmr.msra.gmra.mrb[128].mxu1 %vm323_vm2, %v14580_v22  ;;  %v14611_v37 = vadd.f32 %v2755_v27, %v14462_v38  ;;  %v12297_v39 = vpop.f32.mrb[33].mxu0 }
 0x1d6   : > { %12786 = vmatmul.mubr.msk.f32.vlgmr.msra.gmra.mrb[130].mxu0 %vm323_vm2, %v14580_v22  ;;  %12788 = vmatprep.subr.mxu1 %v13125_v0  ;;  %v10366_v40 = vpop.permute.xlu0 %10365 }
 0x1d7   : > { %12789 = vmatpush3.msk.msra.mxu1 %vm327_vm1, %v10144_v23  ;;  %12793 = vmatprep.subr.mxu0 %v13125_v0  ;;  %v2829_v34 = vpop.f32.mrb[32].mxu1  ;;  %v2903_v41 = vpop.f32.mrb[34].mxu0 }
 0x1d8   : > { %12790 = vmatprep.mubr.msk.f32.mxu1 %vm13126_vm0, %v13125_v0  ;;  %12794 = vmatpush3.msk.msra.mxu0 %vm327_vm1, %v10218_v33  ;;  %v10440_v38 = vpop.permute.xlu1 %10439  ;;  %v14622_v42 = vadd.f32 %v2829_v34, %v14473_v43  ;;  %v14625_v45 = vadd.f32 %v2903_v41, %v14476_v44  ;;  %v12302_v46 = vpop.f32.mrb[33].mxu1 }
 0x1d9   : > { %12795 = vmatprep.mubr.msk.f32.mxu0 %vm13126_vm0, %v13125_v0  ;;  %12791 = vmatmul.mubr.msk.f32.vlgmr.msra.gmra.mrb[130].mxu1 %vm323_vm2, %v14580_v22  ;;  %v12307_v47 = vpop.f32.mrb[35].mxu0 }
 0x1da   : > { %12796 = vmatmul.mubr.msk.f32.vlgmr.msra.gmra.mrb[132].mxu0 %vm323_vm2, %v14580_v22  ;;  %12798 = vmatprep.subr.mxu1 %v13125_v0 }
 0x1db   : > { %12799 = vmatpush3.msk.msra.mxu1 %vm327_vm1, %v10292_v28  ;;  %12803 = vmatprep.subr.mxu0 %v13125_v0  ;;  %v10514_v43 = vpop.permute.xlu0 %10513 }
 0x1dc   : > { %12800 = vmatprep.mubr.msk.f32.mxu1 %vm13126_vm0, %v13125_v0  ;;  %12804 = vmatpush3.msk.msra.mxu0 %vm327_vm1, %v10366_v40  ;;  %v2977_v44 = vpop.f32.mrb[34].mxu1  ;;  %v3051_v48 = vpop.f32.mrb[36].mxu0 }
 0x1dd   : > { %12805 = vmatprep.mubr.msk.f32.mxu0 %vm13126_vm0, %v13125_v0  ;;  %12801 = vmatmul.mubr.msk.f32.vlgmr.msra.gmra.mrb[132].mxu1 %vm323_vm2, %v14580_v22  ;;  %v10588_v49 = vpop.permute.xlu1 %10587  ;;  %v14644_v52 = vadd.f32 %v2977_v44, %v14491_v50  ;;  %v14647_v53 = vadd.f32 %v3051_v48, %v14494_v51  ;;  %v12312_v54 = vpop.f32.mrb[35].mxu1 }
 0x1de   : > { %12806 = vmatmul.mubr.msk.f32.vlgmr.msra.gmra.mrb[134].mxu0 %vm323_vm2, %v14580_v22  ;;  %12808 = vmatprep.subr.mxu1 %v13125_v0  ;;  %v12317_v55 = vpop.f32.mrb[37].mxu0 }
 0x1df   : > { %12809 = vmatpush3.msk.msra.mxu1 %vm327_vm1, %v10440_v38  ;;  %12813 = vmatprep.subr.mxu0 %v13125_v0 }
 0x1e0   : > { %12810 = vmatprep.mubr.msk.f32.mxu1 %vm13126_vm0, %v13125_v0  ;;  %12814 = vmatpush3.msk.msra.mxu0 %vm327_vm1, %v10514_v43  ;;  %v10662_v50 = vpop.permute.xlu0 %10661  ;;  %v3125_v56 = vpop.f32.mrb[36].mxu1 }
 0x1e1   : > { %12815 = vmatprep.mubr.msk.f32.mxu0 %vm13126_vm0, %v13125_v0  ;;  %12811 = vmatmul.mubr.msk.f32.vlgmr.msra.gmra.mrb[134].mxu1 %vm323_vm2, %v14580_v22  ;;  %v14662_v51 = vadd.f32 %v3125_v56, %v14509_v57  ;;  %v3199_v58 = vpop.f32.mrb[38].mxu0  ;;  %v12322_v59 = vpop.f32.mrb[37].mxu1 }
 0x1e2   : > { %12816 = vmatmul.mubr.msk.f32.vlgmr.msra.gmra.mrb[136].mxu0 %vm323_vm2, %v14580_v22  ;;  %12818 = vmatprep.subr.mxu1 %v13125_v0  ;;  %v10736_v61 = vpop.permute.xlu1 %10735  ;;  %v14668_v62 = vadd.f32 %v3199_v58, %v14516_v60  ;;  %v12327_v63 = vpop.f32.mrb[39].mxu0 }
 0x1e3   : > { %12819 = vmatpush3.msk.msra.mxu1 %vm327_vm1, %v10588_v49  ;;  %12823 = vmatprep.subr.mxu0 %v13125_v0 }
 0x1e4   : > { %12820 = vmatprep.mubr.msk.f32.mxu1 %vm13126_vm0, %v13125_v0  ;;  %12824 = vmatpush3.msk.msra.mxu0 %vm327_vm1, %v10662_v50  ;;  %v3273_v57 = vpop.f32.mrb[38].mxu1 }
 0x1e5   : > { %12825 = vmatprep.mubr.msk.f32.mxu0 %vm13126_vm0, %v13125_v0  ;;  %12821 = vmatmul.mubr.msk.f32.vlgmr.msra.gmra.mrb[136].mxu1 %vm323_vm2, %v14580_v22  ;;  %v10810_v1 = vpop.permute.xlu0 %10809  ;;  %v14680_v60 = vadd.f32 %v3273_v57, %v14527_v3  ;;  %v3347_v2 = vpop.f32.mrb[40].mxu0 }
 0x1e6   : > { %12826 = vmatmul.mubr.msk.f32.vlgmr.msra.gmra.mrb[138].mxu0 %vm323_vm2, %v14580_v22  ;;  %12828 = vmatprep.subr.mxu1 %v13125_v0  ;;  %v14686_v5 = vadd.f32 %v3347_v2, %v14530_v4  ;;  %v12332_v6 = vpop.f32.mrb[39].mxu1  ;;  %v12337_v7 = vpop.f32.mrb[41].mxu0 }
 0x1e7   : > { %12829 = vmatpush3.msk.msra.mxu1 %vm327_vm1, %v10736_v61  ;;  %12833 = vmatprep.subr.mxu0 %v13125_v0  ;;  %v10884_v8 = vpop.permute.xlu1 %10883 }
 0x1e8   : > { %12830 = vmatprep.mubr.msk.f32.mxu1 %vm13126_vm0, %v13125_v0  ;;  %12834 = vmatpush3.msk.msra.mxu0 %vm327_vm1, %v10810_v1  ;;  %v3421_v3 = vpop.f32.mrb[40].mxu1 }
 0x1e9   : > { %12835 = vmatprep.mubr.msk.f32.mxu0 %vm13126_vm0, %v13125_v0  ;;  %12831 = vmatmul.mubr.msk.f32.vlgmr.msra.gmra.mrb[138].mxu1 %vm323_vm2, %v14580_v22  ;;  %v14698_v4 = vadd.f32 %v3421_v3, %v14545_v9  ;;  %v3495_v10 = vpop.f32.mrb[42].mxu0  ;;  %v12342_v11 = vpop.f32.mrb[41].mxu1 }
 0x1ea   : > { %12836 = vmatmul.mubr.msk.f32.vlgmr.msra.gmra.mrb[140].mxu0 %vm323_vm2, %v14580_v22  ;;  %12838 = vmatprep.subr.mxu1 %v13125_v0  ;;  %v10958_v12 = vpop.permute.xlu0 %10957  ;;  %v14704_v14 = vadd.f32 %v3495_v10, %v14552_v13  ;;  %v12347_v15 = vpop.f32.mrb[43].mxu0 }
 0x1eb   : > { %12839 = vmatpush3.msk.msra.mxu1 %vm327_vm1, %v10884_v8  ;;  %12843 = vmatprep.subr.mxu0 %v13125_v0 }
 0x1ec   : > { %12840 = vmatprep.mubr.msk.f32.mxu1 %vm13126_vm0, %v13125_v0  ;;  %12844 = vmatpush3.msk.msra.mxu0 %vm327_vm1, %v10958_v12  ;;  %v11032_v9 = vpop.permute.xlu1 %11031  ;;  %v3569_v16 = vpop.f32.mrb[42].mxu1 }
 0x1ed   : > { %12845 = vmatprep.mubr.msk.f32.mxu0 %vm13126_vm0, %v13125_v0  ;;  %12841 = vmatmul.mubr.msk.f32.vlgmr.msra.gmra.mrb[140].mxu1 %vm323_vm2, %v14580_v22  ;;  %v3880_v13 = vadd.f32 %v3569_v16, %v14563_v17  ;;  %v3643_v18 = vpop.f32.mrb[44].mxu0  ;;  %v12352_v20 = vpop.f32.mrb[43].mxu1 }
 0x1ee   : > { %12846 = vmatmul.mubr.msk.f32.vlgmr.msra.gmra.mrb[142].mxu0 %vm323_vm2, %v14580_v22  ;;  %12848 = vmatprep.subr.mxu1 %v13125_v0  ;;  %v3881_v21 = vadd.f32 %v3643_v18, %v14566_v19  ;;  %v12357_v23 = vpop.f32.mrb[45].mxu0 }
 0x1ef   : > { %12849 = vmatpush3.msk.msra.mxu1 %vm327_vm1, %v11032_v9  ;;  %12850 = vmatprep.mubr.msk.f32.mxu1 %vm13126_vm0, %v13125_v0 }
 0x1f0   : > { %v3717_v17 = vpop.f32.mrb[44].mxu1  ;;  %12967 = vset.pattern.permute.xlu0 %v13129_v25 }
 0x1f1   : > { %12851 = vmatmul.mubr.msk.f32.vlgmr.msra.gmra.mrb[142].mxu1 %vm323_vm2, %v14580_v22  ;;  %v3882_v31 = vadd.f32 %v3717_v17, %v14586_v26  ;;  %v3791_v32 = vpop.f32.mrb[46].mxu0  ;;  %v12362_v19 = vpop.f32.mrb[45].mxu1  ;;  %11124 = vperm.xlu0 %12967, %v11121_v24  }
 0x1f2   : > { %v3883_v33 = vadd.f32 %v3791_v32, %v14589_v30  ;;  %v12367_v28 = vpop.f32.mrb[47].mxu0 }
 0x1f4   : > { %v3865_v29 = vpop.f32.mrb[46].mxu1 }
 0x1f5   : > { %v3884_v27 = vadd.f32 %v3865_v29, %v14604_v35  ;;  %v3978_v36 = vpop.f32.mrb[48].mxu0  ;;  %v12372_v39 = vpop.f32.mrb[47].mxu1 }
 0x1f6   : > { %v5077_v0 = vadd.f32 %v3978_v36, %v14611_v37  ;;  %v12377_v40 = vpop.f32.mrb[49].mxu0 }
 0x1f8   : > { %v4051_v34 = vpop.f32.mrb[48].mxu1 }
 0x1f9   : > { %v5078_v41 = vadd.f32 %v4051_v34, %v14622_v42  ;;  %v4124_v22 = vpop.f32.mrb[50].mxu0  ;;  %v12382_v38 = vpop.f32.mrb[49].mxu1 }
 0x1fa   : > { %v5079_v26 = vadd.f32 %v4124_v22, %v14625_v45  ;;  %v12387_v46 = vpop.f32.mrb[51].mxu0 }
 0x1fc   : > { %v4197_v47 = vpop.f32.mrb[50].mxu1 }
 0x1fd   : > { %v5080_v30 = vadd.f32 %v4197_v47, %v14644_v52  ;;  %v4270_v43 = vpop.f32.mrb[52].mxu0  ;;  %v12392_v44 = vpop.f32.mrb[51].mxu1 }
 0x1fe   : > { %v5081_v35 = vadd.f32 %v4270_v43, %v14647_v53  ;;  %v12397_v48 = vpop.f32.mrb[53].mxu0 }
 0x201   : > { %v4343_v49 = vpop.f32.mrb[52].mxu1  ;;  %v4416_v54 = vpop.f32.mrb[54].mxu0 }
 0x202   : > { %v5082_v37 = vadd.f32 %v4343_v49, %v14662_v51  ;;  %v5083_v55 = vadd.f32 %v4416_v54, %v14668_v62  ;;  %v12402_v42 = vpop.f32.mrb[53].mxu1  ;;  %v12407_v50 = vpop.f32.mrb[55].mxu0 }
 0x206   : > { %v4489_v56 = vpop.f32.mrb[54].mxu1  ;;  %v4562_v58 = vpop.f32.mrb[56].mxu0 }
 0x207   : > { %v5084_v45 = vadd.f32 %v4489_v56, %v14680_v60  ;;  %v5085_v59 = vadd.f32 %v4562_v58, %v14686_v5  ;;  %v12412_v52 = vpop.f32.mrb[55].mxu1  ;;  %v12417_v61 = vpop.f32.mrb[57].mxu0 }
 0x20b   : > { %v4635_v63 = vpop.f32.mrb[56].mxu1  ;;  %v4708_v57 = vpop.f32.mrb[58].mxu0 }
 0x20c   : > { %v5086_v53 = vadd.f32 %v4635_v63, %v14698_v4  ;;  %v5087_v1 = vadd.f32 %v4708_v57, %v14704_v14  ;;  %v12422_v2 = vpop.f32.mrb[57].mxu1  ;;  %v12427_v51 = vpop.f32.mrb[59].mxu0 }
 0x210   : > { %v4781_v6 = vpop.f32.mrb[58].mxu1  ;;  %v4854_v62 = vpop.f32.mrb[60].mxu0 }
 0x211   : > { %v5088_v7 = vadd.f32 %v4781_v6, %v3880_v13  ;;  %v5089_v8 = vadd.f32 %v4854_v62, %v3881_v21  ;;  %v12432_v3 = vpop.f32.mrb[59].mxu1  ;;  %v12437_v10 = vpop.f32.mrb[61].mxu0 }
 0x215   : > { %v4927_v11 = vpop.f32.mrb[60].mxu1  ;;  %v5000_v60 = vpop.f32.mrb[62].mxu0 }
 0x216   : > { %v5090_v12 = vadd.f32 %v4927_v11, %v3882_v31  ;;  %v5091_v5 = vadd.f32 %v5000_v60, %v3883_v33  ;;  %v12442_v15 = vpop.f32.mrb[61].mxu1  ;;  %v12447_v9 = vpop.f32.mrb[63].mxu0 }
 0x21a   : > { %v5073_v16 = vpop.f32.mrb[62].mxu1  ;;  %v5168_v18 = vpop.f32.mrb[64].mxu0 }
 0x21b   : > { %v5092_v20 = vadd.f32 %v5073_v16, %v3884_v27  ;;  %v6282_v4 = vadd.f32 %v5168_v18, %v5077_v0  ;;  %v12452_v23 = vpop.f32.mrb[63].mxu1  ;;  %v12457_v14 = vpop.f32.mrb[65].mxu0 }
 0x21f   : > { %v5242_v24 = vpop.f32.mrb[64].mxu1  ;;  %v5316_v17 = vpop.f32.mrb[66].mxu0 }
 0x220   : > { %v6283_v25 = vadd.f32 %v5242_v24, %v5078_v41  ;;  %v6284_v32 = vadd.f32 %v5316_v17, %v5079_v26  ;;  %v12462_v13 = vpop.f32.mrb[65].mxu1  ;;  %v12467_v21 = vpop.f32.mrb[67].mxu0 }
 0x224   : > { %v5390_v19 = vpop.f32.mrb[66].mxu1  ;;  %v5464_v28 = vpop.f32.mrb[68].mxu0 }
 0x225   : > { %v6285_v29 = vadd.f32 %v5390_v19, %v5080_v30  ;;  %v6286_v36 = vadd.f32 %v5464_v28, %v5081_v35  ;;  %v12472_v31 = vpop.f32.mrb[67].mxu1  ;;  %v12477_v33 = vpop.f32.mrb[69].mxu0 }
 0x229   : > { %v5538_v39 = vpop.f32.mrb[68].mxu1  ;;  %v5612_v40 = vpop.f32.mrb[70].mxu0 }
 0x22a   : > { %v6287_v34 = vadd.f32 %v5538_v39, %v5082_v37  ;;  %v6288_v22 = vadd.f32 %v5612_v40, %v5083_v55  ;;  %v12482_v27 = vpop.f32.mrb[69].mxu1  ;;  %v12487_v0 = vpop.f32.mrb[71].mxu0 }
 0x22e   : > { %v5686_v38 = vpop.f32.mrb[70].mxu1  ;;  %v5760_v46 = vpop.f32.mrb[72].mxu0 }
 0x22f   : > { %v6289_v47 = vadd.f32 %v5686_v38, %v5084_v45  ;;  %v6290_v43 = vadd.f32 %v5760_v46, %v5085_v59  ;;  %v12492_v41 = vpop.f32.mrb[71].mxu1  ;;  %v12497_v26 = vpop.f32.mrb[73].mxu0 }
 0x233   : > { %v5834_v44 = vpop.f32.mrb[72].mxu1  ;;  %v5908_v48 = vpop.f32.mrb[74].mxu0 }
 0x234   : > { %v6291_v49 = vadd.f32 %v5834_v44, %v5086_v53  ;;  %v6292_v54 = vadd.f32 %v5908_v48, %v5087_v1  ;;  %v12502_v30 = vpop.f32.mrb[73].mxu1  ;;  %v12507_v35 = vpop.f32.mrb[75].mxu0 }
 0x238   : > { %v5982_v42 = vpop.f32.mrb[74].mxu1  ;;  %v6056_v50 = vpop.f32.mrb[76].mxu0 }
 0x239   : > { %v6293_v56 = vadd.f32 %v5982_v42, %v5088_v7  ;;  %v6294_v58 = vadd.f32 %v6056_v50, %v5089_v8  ;;  %v12512_v37 = vpop.f32.mrb[75].mxu1  ;;  %v12517_v55 = vpop.f32.mrb[77].mxu0 }
 0x23d   : > { %v6130_v52 = vpop.f32.mrb[76].mxu1  ;;  %v6204_v61 = vpop.f32.mrb[78].mxu0 }
 0x23e   : > { %v6295_v63 = vadd.f32 %v6130_v52, %v5090_v12  ;;  %v6296_v57 = vadd.f32 %v6204_v61, %v5091_v5  ;;  %v12522_v45 = vpop.f32.mrb[77].mxu1  ;;  %v12527_v59 = vpop.f32.mrb[79].mxu0 }
 0x242   : > { %v6278_v2 = vpop.f32.mrb[78].mxu1  ;;  %v6373_v51 = vpop.f32.mrb[80].mxu0 }
 0x243   : > { %v6297_v6 = vadd.f32 %v6278_v2, %v5092_v20  ;;  %v7487_v62 = vadd.f32 %v6373_v51, %v6282_v4  ;;  %v12532_v53 = vpop.f32.mrb[79].mxu1  ;;  %v12537_v1 = vpop.f32.mrb[81].mxu0 }
 0x247   : > { %v6447_v3 = vpop.f32.mrb[80].mxu1  ;;  %v6521_v10 = vpop.f32.mrb[82].mxu0 }
 0x248   : > { %v7488_v11 = vadd.f32 %v6447_v3, %v6283_v25  ;;  %v7489_v60 = vadd.f32 %v6521_v10, %v6284_v32  ;;  %v12542_v7 = vpop.f32.mrb[81].mxu1  ;;  %v12547_v8 = vpop.f32.mrb[83].mxu0 }
 0x24c   : > { %v6595_v15 = vpop.f32.mrb[82].mxu1  ;;  %v6669_v9 = vpop.f32.mrb[84].mxu0 }
 0x24d   : > { %v7490_v16 = vadd.f32 %v6595_v15, %v6285_v29  ;;  %v7491_v18 = vadd.f32 %v6669_v9, %v6286_v36  ;;  %v12552_v12 = vpop.f32.mrb[83].mxu1  ;;  %v12557_v5 = vpop.f32.mrb[85].mxu0 }
 0x250   : > { %v6743_v23 = vpop.f32.mrb[84].mxu1 }
 0x251   : > { %v7492_v14 = vadd.f32 %v6743_v23, %v6287_v34  ;;  %v6817_v24 = vpop.f32.mrb[86].mxu0  ;;  %v12562_v17 = vpop.f32.mrb[85].mxu1 }
 0x252   : > { %v7493_v20 = vadd.f32 %v6817_v24, %v6288_v22  ;;  %v12567_v4 = vpop.f32.mrb[87].mxu0 }
 0x254   : > { %v6891_v13 = vpop.f32.mrb[86].mxu1 }
 0x255   : > { %v7494_v21 = vadd.f32 %v6891_v13, %v6289_v47  ;;  %v6965_v19 = vpop.f32.mrb[88].mxu0  ;;  %v12572_v28 = vpop.f32.mrb[87].mxu1 }
 0x256   : > { %v7495_v25 = vadd.f32 %v6965_v19, %v6290_v43  ;;  %v12577_v32 = vpop.f32.mrb[89].mxu0 }
 0x258   : > { %v7039_v31 = vpop.f32.mrb[88].mxu1 }
 0x259   : > { %v7496_v33 = vadd.f32 %v7039_v31, %v6291_v49  ;;  %v7113_v39 = vpop.f32.mrb[90].mxu0  ;;  %v12582_v40 = vpop.f32.mrb[89].mxu1 }
 0x25a   : > { %v7497_v29 = vadd.f32 %v7113_v39, %v6292_v54  ;;  %v12587_v36 = vpop.f32.mrb[91].mxu0 }
 0x25c   : > { %v7187_v27 = vpop.f32.mrb[90].mxu1 }
 0x25d   : > { %v7498_v0 = vadd.f32 %v7187_v27, %v6293_v56  ;;  %v7261_v38 = vpop.f32.mrb[92].mxu0  ;;  %v12592_v34 = vpop.f32.mrb[91].mxu1 }
 0x25e   : > { %v7499_v46 = vadd.f32 %v7261_v38, %v6294_v58  ;;  %v12597_v41 = vpop.f32.mrb[93].mxu0 }
 0x260   : > { %v7335_v22 = vpop.f32.mrb[92].mxu1 }
 0x261   : > { %v7500_v26 = vadd.f32 %v7335_v22, %v6295_v63  ;;  %v7409_v44 = vpop.f32.mrb[94].mxu0  ;;  %v12602_v47 = vpop.f32.mrb[93].mxu1 }
 0x262   : > { %v7501_v48 = vadd.f32 %v7409_v44, %v6296_v57  ;;  %v12607_v30 = vpop.f32.mrb[95].mxu0 }
 0x264   : > { %v7483_v43 = vpop.f32.mrb[94].mxu1 }
 0x265   : > { %v7502_v35 = vadd.f32 %v7483_v43, %v6297_v6  ;;  %v7596_v42 = vpop.f32.mrb[96].mxu0  ;;  %v12612_v49 = vpop.f32.mrb[95].mxu1 }
 0x266   : > { %v8695_v50 = vadd.f32 %v7596_v42, %v7487_v62  ;;  %v12617_v37 = vpop.f32.mrb[97].mxu0 }
 0x268   : > { %v7669_v54 = vpop.f32.mrb[96].mxu1 }
 0x269   : > { %v8696_v55 = vadd.f32 %v7669_v54, %v7488_v11  ;;  %v7742_v52 = vpop.f32.mrb[98].mxu0  ;;  %v12622_v56 = vpop.f32.mrb[97].mxu1 }
 0x26a   : > { %v8697_v61 = vadd.f32 %v7742_v52, %v7489_v60  ;;  %v12627_v45 = vpop.f32.mrb[99].mxu0 }
 0x26c   : > { %v7815_v58 = vpop.f32.mrb[98].mxu1 }
 0x26d   : > { %v8698_v59 = vadd.f32 %v7815_v58, %v7490_v16  ;;  %v7888_v2 = vpop.f32.mrb[100].mxu0  ;;  %v12632_v63 = vpop.f32.mrb[99].mxu1 }
 0x26e   : > { %v8699_v51 = vadd.f32 %v7888_v2, %v7491_v18  ;;  %v12637_v53 = vpop.f32.mrb[101].mxu0 }
 0x270   : > { %v7961_v57 = vpop.f32.mrb[100].mxu1 }
 0x271   : > { %v8700_v1 = vadd.f32 %v7961_v57, %v7492_v14  ;;  %v8034_v3 = vpop.f32.mrb[102].mxu0  ;;  %v12642_v6 = vpop.f32.mrb[101].mxu1 }
 0x272   : > { %v8701_v10 = vadd.f32 %v8034_v3, %v7493_v20  ;;  %v12647_v7 = vpop.f32.mrb[103].mxu0 }
 0x274   : > { %v8107_v62 = vpop.f32.mrb[102].mxu1 }
 0x275   : > { %v8702_v8 = vadd.f32 %v8107_v62, %v7494_v21  ;;  %v8180_v15 = vpop.f32.mrb[104].mxu0  ;;  %v12652_v11 = vpop.f32.mrb[103].mxu1 }
 0x276   : > { %v8703_v9 = vadd.f32 %v8180_v15, %v7495_v25  ;;  %v12657_v12 = vpop.f32.mrb[105].mxu0  ;;  %v11143_v15 = vlaneseq }
 0x278   : > { %v8253_v60 = vpop.f32.mrb[104].mxu1 }
 0x279   : > { %v8704_v5 = vadd.f32 %v8253_v60, %v7496_v33  ;;  %v8326_v23 = vpop.f32.mrb[106].mxu0  ;;  %v12662_v16 = vpop.f32.mrb[105].mxu1 }
 0x27a   : > { %v8705_v24 = vadd.f32 %v8326_v23, %v7497_v29  ;;  %v12667_v17 = vpop.f32.mrb[107].mxu0  ;;  %v14767_v16 = vand.u32 127, %v11143_v15 }
 0x27b   : > { %v14769_v17 = vpop.permute.xlu0 %11124 }
 0x27c   : > { %v8399_v18 = vpop.f32.mrb[106].mxu1  ;;  %vm11145_vm3 = vcmp.lt.s32.totalorder %v14767_v16, 32 }
 0x27d   : > { %v8706_v4 = vadd.f32 %v8399_v18, %v7498_v0  ;;  %v8472_v13 = vpop.f32.mrb[108].mxu0  ;;  %v12672_v14 = vpop.f32.mrb[107].mxu1 }
 0x27e   : > { %v8707_v19 = vadd.f32 %v8472_v13, %v7499_v46  ;;  %v12677_v28 = vpop.f32.mrb[109].mxu0 }
 0x280   : > { %v8545_v20 = vpop.f32.mrb[108].mxu1 }
 0x281   : > { %v8708_v32 = vadd.f32 %v8545_v20, %v7500_v26  ;;  %v8618_v31 = vpop.f32.mrb[110].mxu0  ;;  %v12682_v21 = vpop.f32.mrb[109].mxu1 }
 0x282   : > { %v8709_v39 = vadd.f32 %v8618_v31, %v7501_v48  ;;  %v12687_v40 = vpop.f32.mrb[111].mxu0 }
 0x284   : > { %v8691_v25 = vpop.f32.mrb[110].mxu1 }
 0x285   : > { %v8710_v36 = vadd.f32 %v8691_v25, %v7502_v35  ;;  %v8786_v27 = vpop.f32.mrb[112].mxu0  ;;  %v12692_v33 = vpop.f32.mrb[111].mxu1 }
 0x286   : > { %v9900_v38 = vadd.f32 %v8786_v27, %v8695_v50  ;;  %v12697_v34 = vpop.f32.mrb[113].mxu0 }
 0x288   : > { %v8860_v29 = vpop.f32.mrb[112].mxu1 }
 0x289   : > { %v9901_v41 = vadd.f32 %v8860_v29, %v8696_v55  ;;  %v8934_v22 = vpop.f32.mrb[114].mxu0  ;;  %v12702_v0 = vpop.f32.mrb[113].mxu1 }
 0x28a   : > { %v9902_v44 = vadd.f32 %v8934_v22, %v8697_v61  ;;  %v12707_v47 = vpop.f32.mrb[115].mxu0 }
 0x28c   : > { %v9008_v46 = vpop.f32.mrb[114].mxu1 }
 0x28d   : > { %v14742_v30 = vadd.f32 %v9008_v46, %v8698_v59  ;;  %v9082_v26 = vpop.f32.mrb[116].mxu0  ;;  %v12712_v43 = vpop.f32.mrb[115].mxu1 }
 0x28e   : > { %v14744_v42 = vadd.f32 %v9082_v26, %v8699_v51  ;;  %v12717_v48 = vpop.f32.mrb[117].mxu0 }
 0x290   : > { %v9156_v49 = vpop.f32.mrb[116].mxu1 }
 0x291   : > { %v14746_v35 = vadd.f32 %v9156_v49, %v8700_v1  ;;  %v9230_v37 = vpop.f32.mrb[118].mxu0  ;;  %v12722_v50 = vpop.f32.mrb[117].mxu1 }
 0x292   : > { %v14748_v54 = vadd.f32 %v9230_v37, %v8701_v10  ;;  %v12727_v55 = vpop.f32.mrb[119].mxu0 }
 0x294   : > { %v9304_v52 = vpop.f32.mrb[118].mxu1 }
 0x295   : > { %v14750_v56 = vadd.f32 %v9304_v52, %v8702_v8  ;;  %v9378_v61 = vpop.f32.mrb[120].mxu0  ;;  %v12732_v45 = vpop.f32.mrb[119].mxu1 }
 0x296   : > { %v14752_v58 = vadd.f32 %v9378_v61, %v8703_v9  ;;  %v12737_v59 = vpop.f32.mrb[121].mxu0 }
 0x298   : > { %v9452_v2 = vpop.f32.mrb[120].mxu1 }
 0x299   : > { %v14754_v63 = vadd.f32 %v9452_v2, %v8704_v5  ;;  %v9526_v51 = vpop.f32.mrb[122].mxu0  ;;  %v12742_v53 = vpop.f32.mrb[121].mxu1 }
 0x29a   : > { %v14756_v57 = vadd.f32 %v9526_v51, %v8705_v24  ;;  %v12747_v1 = vpop.f32.mrb[123].mxu0 }
 0x29c   : > { %v9600_v3 = vpop.f32.mrb[122].mxu1 }
 0x29d   : > { %v14758_v6 = vadd.f32 %v9600_v3, %v8706_v4  ;;  %v9674_v10 = vpop.f32.mrb[124].mxu0  ;;  %v12752_v7 = vpop.f32.mrb[123].mxu1 }
 0x29e   : > { %v14760_v62 = vadd.f32 %v9674_v10, %v8707_v19  ;;  %v12757_v8 = vpop.f32.mrb[125].mxu0 }
 0x2a0   : > { %v9748_v11 = vpop.f32.mrb[124].mxu1 }
 0x2a1   : > { %v14762_v9 = vadd.f32 %v9748_v11, %v8708_v32  ;;  %v9822_v12 = vpop.f32.mrb[126].mxu0  ;;  %v12762_v60 = vpop.f32.mrb[125].mxu1 }
 0x2a2   : > { %v14765_v5 = vadd.f32 %v9822_v12, %v8709_v39  ;;  %v12767_v23 = vpop.f32.mrb[127].mxu0 }
 0x2a4   : > { %v9896_v24 = vpop.f32.mrb[126].mxu1 }
 0x2a5   : > { %v14773_v18 = vadd.f32 %v9896_v24, %v8710_v36  ;;  %v9991_v4 = vpop.f32.mrb[128].mxu0  ;;  %v12772_v13 = vpop.f32.mrb[127].mxu1 }
 0x2a6   : > { %v11105_v14 = vadd.f32 %v9991_v4, %v9900_v38  ;;  %v12777_v19 = vpop.f32.mrb[129].mxu0 }
 0x2a8   : > { %v10065_v28 = vpop.f32.mrb[128].mxu1  ;;  %v11127_v20 = vadd.f32 %v14769_v17, %v11105_v14 }
 0x2a9   : > { %v11106_v32 = vadd.f32 %v10065_v28, %v9901_v41  ;;  %v10139_v31 = vpop.f32.mrb[130].mxu0  ;;  %v12782_v21 = vpop.f32.mrb[129].mxu1 }
 0x2aa   : > { %v11148_v39 = vsel %vm11145_vm3, %v11127_v20, 0.0  ;;  %v11164_v40 = vmul.f32 %v11127_v20, %v11127_v20  ;;  %11268 = vst.msk [vmem:[%s14779_s10] sm:$0xff] %vm11196_vm4, %v11127_v20  ;;  %v11107_v25 = vadd.f32 %v10139_v31, %v9902_v44  ;;  %v12787_v36 = vpop.f32.mrb[131].mxu0 }
 0x2ab   : > { %v11128_v27 = vadd.f32 %v14769_v17, %v11106_v32  ;;  %v11197_v22 = vsel %vm11196_vm4, %v11148_v39, 0.0 }
 0x2ac   : > { %v11180_v33 = vsel %vm11145_vm3, %v11164_v40, 0.0  ;;  %v11129_v38 = vadd.f32 %v14769_v17, %v11107_v25  ;;  %v10213_v34 = vpop.f32.mrb[130].mxu1 }
 0x2ad   : > { %v11149_v29 = vsel %vm11145_vm3, %v11128_v27, 0.0  ;;  %v11165_v41 = vmul.f32 %v11128_v27, %v11128_v27  ;;  %11269 = vst.msk [vmem:[%s14779_s10 + $0x8] sm:$0xff] %vm11196_vm4, %v11128_v27  ;;  %v11108_v0 = vadd.f32 %v10213_v34, %v14742_v30  ;;  %v10287_v44 = vpop.f32.mrb[132].mxu0  ;;  %v12792_v47 = vpop.f32.mrb[131].mxu1  ;;  %v11233_v30 = vsel %vm11196_vm4, %v11180_v33, 0.0 }
 0x2ae   : > { %v11198_v46 = vsel %vm11196_vm4, %v11149_v29, 0.0  ;;  %v11150_v26 = vsel %vm11145_vm3, %v11129_v38, 0.0  ;;  %v11166_v43 = vmul.f32 %v11129_v38, %v11129_v38  ;;  %11270 = vst.msk [vmem:[%s14779_s10 + $0x10] sm:$0xff] %vm11196_vm4, %v11129_v38  ;;  %v11109_v48 = vadd.f32 %v10287_v44, %v14744_v42  ;;  %v12797_v49 = vpop.f32.mrb[133].mxu0 }
 0x2af   : > { %v11181_v37 = vsel %vm11145_vm3, %v11165_v41, 0.0  ;;  %v11199_v50 = vadd.f32 %v11198_v46, %v11197_v22  ;;  %v11130_v55 = vadd.f32 %v14769_v17, %v11108_v0  ;;  %v11200_v45 = vsel %vm11196_vm4, %v11150_v26, 0.0 }
 0x2b0   : > { %v11234_v52 = vsel %vm11196_vm4, %v11181_v37, 0.0  ;;  %v11182_v61 = vsel %vm11145_vm3, %v11166_v43, 0.0  ;;  %v11131_v59 = vadd.f32 %v14769_v17, %v11109_v48  ;;  %v10361_v42 = vpop.f32.mrb[132].mxu1 }
 0x2b1   : > { %v11235_v2 = vadd.f32 %v11234_v52, %v11233_v30  ;;  %v11201_v51 = vadd.f32 %v11200_v45, %v11199_v50  ;;  %v11236_v53 = vsel %vm11196_vm4, %v11182_v61, 0.0  ;;  %v11151_v1 = vsel %vm11145_vm3, %v11130_v55, 0.0  ;;  %11271 = vst.msk [vmem:[%s14779_s10 + $0x18] sm:$0xff] %vm11196_vm4, %v11130_v55  ;;  %v10435_v3 = vpop.f32.mrb[134].mxu0  ;;  %v12802_v10 = vpop.f32.mrb[133].mxu1 }
 0x2b2   : > { %v11167_v7 = vmul.f32 %v11130_v55, %v11130_v55  ;;  %v11202_v8 = vsel %vm11196_vm4, %v11151_v1, 0.0  ;;  %v11152_v15 = vsel %vm11145_vm3, %v11131_v59, 0.0  ;;  %v11168_v11 = vmul.f32 %v11131_v59, %v11131_v59  ;;  %11272 = vst.msk [vmem:[%s14779_s10 + $0x20] sm:$0xff] %vm11196_vm4, %v11131_v59  ;;  %v12807_v12 = vpop.f32.mrb[135].mxu0 }
 0x2b3   : > { %v11237_v60 = vadd.f32 %v11236_v53, %v11235_v2  ;;  %v11203_v23 = vadd.f32 %v11202_v8, %v11201_v51  ;;  %v11110_v24 = vadd.f32 %v10361_v42, %v14746_v35  ;;  %v11204_v14 = vsel %vm11196_vm4, %v11152_v15, 0.0 }
 0x2b4   : > { %v11183_v4 = vsel %vm11145_vm3, %v11167_v7, 0.0  ;;  %v11184_v13 = vsel %vm11145_vm3, %v11168_v11, 0.0  ;;  %v11111_v19 = vadd.f32 %v10435_v3, %v14748_v54  ;;  %v10509_v28 = vpop.f32.mrb[134].mxu1 }
 0x2b5   : > { %v11238_v20 = vsel %vm11196_vm4, %v11183_v4, 0.0  ;;  %v11205_v32 = vadd.f32 %v11204_v14, %v11203_v23  ;;  %v11132_v31 = vadd.f32 %v14769_v17, %v11110_v24  ;;  %v10583_v21 = vpop.f32.mrb[136].mxu0  ;;  %v12812_v35 = vpop.f32.mrb[135].mxu1  ;;  %v11112_v25 = vadd.f32 %v10509_v28, %v14750_v56 }
 0x2b6   : > { %v11239_v39 = vadd.f32 %v11238_v20, %v11237_v60  ;;  %v11133_v40 = vadd.f32 %v14769_v17, %v11111_v19  ;;  %v11113_v36 = vadd.f32 %v10583_v21, %v14752_v58  ;;  %v12817_v27 = vpop.f32.mrb[137].mxu0  ;;  %v11240_v33 = vsel %vm11196_vm4, %v11184_v13, 0.0 }
 0x2b7   : > { %v11153_v54 = vsel %vm11145_vm3, %v11132_v31, 0.0  ;;  %v11169_v38 = vmul.f32 %v11132_v31, %v11132_v31  ;;  %11273 = vst.msk [vmem:[%s14779_s10 + $0x28] sm:$0xff] %vm11196_vm4, %v11132_v31  ;;  %v11134_v47 = vadd.f32 %v14769_v17, %v11112_v25 }
 0x2b8   : > { %v11241_v34 = vadd.f32 %v11240_v33, %v11239_v39  ;;  %v11206_v29 = vsel %vm11196_vm4, %v11153_v54, 0.0  ;;  %v11154_v41 = vsel %vm11145_vm3, %v11133_v40, 0.0  ;;  %v11170_v22 = vmul.f32 %v11133_v40, %v11133_v40  ;;  %11274 = vst.msk [vmem:[%s14779_s10 + $0x30] sm:$0xff] %vm11196_vm4, %v11133_v40  ;;  %v10657_v56 = vpop.f32.mrb[136].mxu1 }
 0x2b9   : > { %v11185_v58 = vsel %vm11145_vm3, %v11169_v38, 0.0  ;;  %v11207_v0 = vadd.f32 %v11206_v29, %v11205_v32  ;;  %v11208_v44 = vsel %vm11196_vm4, %v11154_v41, 0.0  ;;  %v10731_v46 = vpop.f32.mrb[138].mxu0  ;;  %v12822_v26 = vpop.f32.mrb[137].mxu1  ;;  %v11135_v49 = vadd.f32 %v14769_v17, %v11113_v36  ;;  %11275 = vst.msk [vmem:[%s14779_s10 + $0x38] sm:$0xff] %vm11196_vm4, %v11134_v47 }
 0x2ba   : > { %v11242_v43 = vsel %vm11196_vm4, %v11185_v58, 0.0  ;;  %v11186_v48 = vsel %vm11145_vm3, %v11170_v22, 0.0  ;;  %v11114_v37 = vadd.f32 %v10657_v56, %v14754_v63  ;;  %v12827_v50 = vpop.f32.mrb[139].mxu0  ;;  %v11155_v61 = vsel %vm11145_vm3, %v11134_v47, 0.0 }
 0x2bb   : > { %v11243_v30 = vadd.f32 %v11242_v43, %v11241_v34  ;;  %v11209_v55 = vadd.f32 %v11208_v44, %v11207_v0  ;;  %v11244_v52 = vsel %vm11196_vm4, %v11186_v48, 0.0  ;;  %v11171_v45 = vmul.f32 %v11134_v47, %v11134_v47  ;;  %11276 = vst.msk [vmem:[%s14779_s10 + $0x40] sm:$0xff] %vm11196_vm4, %v11135_v49 }
 0x2bc   : > { %v11210_v59 = vsel %vm11196_vm4, %v11155_v61, 0.0  ;;  %v11156_v42 = vsel %vm11145_vm3, %v11135_v49, 0.0  ;;  %v11172_v2 = vmul.f32 %v11135_v49, %v11135_v49  ;;  %v10805_v63 = vpop.f32.mrb[138].mxu1  ;;  %v11136_v3 = vadd.f32 %v14769_v17, %v11114_v37 }
 0x2bd   : > { %v11245_v51 = vadd.f32 %v11244_v52, %v11243_v30  ;;  %v11211_v53 = vadd.f32 %v11210_v59, %v11209_v55  ;;  %v11212_v1 = vsel %vm11196_vm4, %v11156_v42, 0.0  ;;  %v10879_v10 = vpop.f32.mrb[140].mxu0  ;;  %v12832_v7 = vpop.f32.mrb[139].mxu1  ;;  %v11187_v8 = vsel %vm11145_vm3, %v11171_v45, 0.0 }
 0x2be   : > { %v11188_v15 = vsel %vm11145_vm3, %v11172_v2, 0.0  ;;  %v11115_v11 = vadd.f32 %v10731_v46, %v14756_v57  ;;  %v11116_v12 = vadd.f32 %v10805_v63, %v14758_v6  ;;  %v12837_v60 = vpop.f32.mrb[141].mxu0  ;;  %v11246_v23 = vsel %vm11196_vm4, %v11187_v8, 0.0  ;;  %11277 = vst.msk [vmem:[%s14779_s10 + $0x48] sm:$0xff] %vm11196_vm4, %v11136_v3 }
 0x2bf   : > { %v11213_v24 = vadd.f32 %v11212_v1, %v11211_v53  ;;  %v11248_v4 = vsel %vm11196_vm4, %v11188_v15, 0.0  ;;  %v11157_v13 = vsel %vm11145_vm3, %v11136_v3, 0.0  ;;  %v11247_v14 = vadd.f32 %v11246_v23, %v11245_v51 }
 0x2c0   : > { %v11173_v19 = vmul.f32 %v11136_v3, %v11136_v3  ;;  %v11214_v28 = vsel %vm11196_vm4, %v11157_v13, 0.0  ;;  %v11137_v57 = vadd.f32 %v14769_v17, %v11115_v11  ;;  %v10953_v20 = vpop.f32.mrb[140].mxu1  ;;  %v11138_v32 = vadd.f32 %v14769_v17, %v11116_v12 }
 0x2c1   : > { %v11215_v6 = vadd.f32 %v11214_v28, %v11213_v24  ;;  %v11117_v31 = vadd.f32 %v10879_v10, %v14760_v62  ;;  %v11118_v21 = vadd.f32 %v10953_v20, %v14762_v9  ;;  %v11027_v35 = vpop.f32.mrb[142].mxu0  ;;  %v12842_v39 = vpop.f32.mrb[141].mxu1  ;;  %v11249_v40 = vadd.f32 %v11248_v4, %v11247_v14 }
 0x2c2   : > { %v11189_v25 = vsel %vm11145_vm3, %v11173_v19, 0.0  ;;  %v11158_v36 = vsel %vm11145_vm3, %v11137_v57, 0.0  ;;  %v11174_v27 = vmul.f32 %v11137_v57, %v11137_v57  ;;  %11278 = vst.msk [vmem:[%s14779_s10 + $0x50] sm:$0xff] %vm11196_vm4, %v11137_v57  ;;  %v12847_v33 = vpop.f32.mrb[143].mxu0  ;;  %v11159_v62 = vsel %vm11145_vm3, %v11138_v32, 0.0  ;;  %11279 = vst.msk [vmem:[%s14779_s10 + $0x58] sm:$0xff] %vm11196_vm4, %v11138_v32 }
 0x2c3   : > { %v11250_v54 = vsel %vm11196_vm4, %v11189_v25, 0.0  ;;  %v11216_v38 = vsel %vm11196_vm4, %v11158_v36, 0.0  ;;  %v11175_v9 = vmul.f32 %v11138_v32, %v11138_v32  ;;  %v11218_v22 = vsel %vm11196_vm4, %v11159_v62, 0.0 }
 0x2c4   : > { %v11251_v34 = vadd.f32 %v11250_v54, %v11249_v40  ;;  %v11190_v29 = vsel %vm11145_vm3, %v11174_v27, 0.0  ;;  %v11217_v41 = vadd.f32 %v11216_v38, %v11215_v6  ;;  %v11101_v56 = vpop.f32.mrb[142].mxu1  ;;  %v11139_v44 = vadd.f32 %v14769_v17, %v11117_v31 }
 0x2c5   : > { %v11252_v58 = vsel %vm11196_vm4, %v11190_v29, 0.0  ;;  %v11191_v0 = vsel %vm11145_vm3, %v11175_v9, 0.0  ;;  %v11140_v47 = vadd.f32 %v14769_v17, %v11118_v21  ;;  %v12852_v46 = vpop.f32.mrb[143].mxu1  ;;  %v11119_v49 = vadd.f32 %v11027_v35, %v14765_v5 }
 0x2c6   : > { %v11253_v26 = vadd.f32 %v11252_v58, %v11251_v34  ;;  %v11219_v43 = vadd.f32 %v11218_v22, %v11217_v41  ;;  %v11254_v48 = vsel %vm11196_vm4, %v11191_v0, 0.0  ;;  %v11160_v37 = vsel %vm11145_vm3, %v11139_v44, 0.0  ;;  %11280 = vst.msk [vmem:[%s14779_s10 + $0x60] sm:$0xff] %vm11196_vm4, %v11139_v44 }
 0x2c7   : > { %v11176_v50 = vmul.f32 %v11139_v44, %v11139_v44  ;;  %v11161_v30 = vsel %vm11145_vm3, %v11140_v47, 0.0  ;;  %v11177_v55 = vmul.f32 %v11140_v47, %v11140_v47  ;;  %11281 = vst.msk [vmem:[%s14779_s10 + $0x68] sm:$0xff] %vm11196_vm4, %v11140_v47  ;;  %v11220_v61 = vsel %vm11196_vm4, %v11160_v37, 0.0 }
 0x2c8   : > { %v11255_v52 = vadd.f32 %v11254_v48, %v11253_v26  ;;  %v11141_v45 = vadd.f32 %v14769_v17, %v11119_v49  ;;  %v11120_v5 = vadd.f32 %v11101_v56, %v14773_v18  ;;  %v11221_v2 = vadd.f32 %v11220_v61, %v11219_v43 }
 0x2c9   : > { %v11192_v59 = vsel %vm11145_vm3, %v11176_v50, 0.0  ;;  %v11193_v42 = vsel %vm11145_vm3, %v11177_v55, 0.0  ;;  %v11222_v63 = vsel %vm11196_vm4, %v11161_v30, 0.0 }
 0x2ca   : > { %v11256_v51 = vsel %vm11196_vm4, %v11192_v59, 0.0  ;;  %v11178_v53 = vmul.f32 %v11141_v45, %v11141_v45  ;;  %11282 = vst.msk [vmem:[%s14779_s10 + $0x70] sm:$0xff] %vm11196_vm4, %v11141_v45  ;;  %v11142_v1 = vadd.f32 %v14769_v17, %v11120_v5  ;;  %v11162_v3 = vsel %vm11145_vm3, %v11141_v45, 0.0 }
 0x2cb   : > { %v11223_v18 = vadd.f32 %v11222_v63, %v11221_v2  ;;  %v11257_v10 = vadd.f32 %v11256_v51, %v11255_v52  ;;  %v11258_v7 = vsel %vm11196_vm4, %v11193_v42, 0.0  ;;  %v11224_v11 = vsel %vm11196_vm4, %v11162_v3, 0.0 }
 0x2cc   : > { %v11179_v8 = vmul.f32 %v11142_v1, %v11142_v1  ;;  %11283 = vst.msk [vmem:[%s14779_s10 + $0x78] sm:$0xff] %vm11196_vm4, %v11142_v1  ;;  %v11163_v15 = vsel %vm11145_vm3, %v11142_v1, 0.0  ;;  %v11194_v17 = vsel %vm11145_vm3, %v11178_v53, 0.0  ;;  %s13002_s10 = sshll.u32 %s13130_s30, 4  ;;  %s13003_s10 = int_to_ptr.vmem [resolvable:$false] %s13002_s10 }
 0x2cd   : > { %v11225_v12 = vadd.f32 %v11224_v11, %v11223_v18  ;;  %v11226_v60 = vsel %vm11196_vm4, %v11163_v15, 0.0  ;;  %v11259_v23 = vadd.f32 %v11258_v7, %v11257_v10  ;;  %v11260_v4 = vsel %vm11196_vm4, %v11194_v17, 0.0  ;;  %s13004_s6 = scalar_lea.vmem %s13003_s10, 4096  ;;  %p13005_p0 = scmp.lt.s32.totalorder %s14940_s11, %s13003_s10 }
 0x2ce   : > { %v11195_v24 = vsel %vm11145_vm3, %v11179_v8, 0.0  ;;  %p13006_p1 = scmp.lt.s32.totalorder %s13004_s6, %s12998_s7 }
 0x2cf   : > { %v11227_v13 = vadd.f32 %v11226_v60, %v11225_v12  ;;  %v11261_v14 = vadd.f32 %v11260_v4, %v11259_v23  ;;  %v11262_v19 = vsel %vm11196_vm4, %v11195_v24, 0.0 }
 0x2d0   : > { %p13007_p3 = por %p13006_p1, %p13005_p0 }
 0x2d1   : > { %v11228_v28 = vsel %vm11196_vm4, %v11227_v13, 0.0  ;;  %v11263_v57 = vadd.f32 %v11262_v19, %v11261_v14 }
 0x2d2   : > { %11229 = vadd.xlane.f32.xlu1 %v11228_v28  ;;  %p13008_p8 = pnand %p13007_p3, %p13001_p4 }
 0x2d3   : > { %v11264_v20 = vsel %vm11196_vm4, %v11263_v57, 0.0 }
 0x2d4   : > { %11265 = vadd.xlane.f32.xlu0 %v11264_v20 }
 0x2d5   : > { %13011 = shalt.err (!%p13008_p8)
}
 0x2d6   : > { %s13012_s29 = scalar_lea.hbm %s14945_s14, 2048  ;;  %s13016_s9 = scalar_lea.hbm %s15023_s3, 8192 }
 0x2d7   : > { %p13013_p10 = scmp.ne.s32.totalorder %s14945_s14, %s13012_s29  ;;  %p13017_p5 = scmp.lt.u32.totalorder %s14945_s14, %s15023_s3 }
 0x2d8   : > { %p13018_p6 = scmp.lt.u32.totalorder %s13016_s9, %s13012_s29  ;;  %p13020_p7 = scmp.lt.u32.totalorder %s13012_s29, %s14945_s14 }
 0x2d9   : > { %p13014_p11 = pnand %p13013_p10, %p15043_p12 }
 0x2da   : > { %p13019_p9 = por %p13018_p6, %p13017_p5 }
 0x2db   : > { %p13015_p13 = pneg %p13014_p11 }
 0x2dc   : > { %p13021_p2 = por %p13020_p7, %p13019_p9 }
 0x2de   : > { %p13022_p4 = pnand %p13021_p2, %p13015_p13 }
 0x2e0   : > { %13025 = shalt.err (!%p13022_p4)
}
 0x2e1   : > { %s13131_s7 = smov 128   ;;  %s13132_s30 = smov 8   ;;  %vm11231_vm5 = vcmask 7168  }
 0x2e2   : > { %12858 = dma.vmem_to_hbm [thread:$0]  (%p15043_p12), %s14940_s11, 2048, %s14945_s14, %s14949_s8, %s13131_s7, %s13131_s7, %s13132_s30  }
 0x2e3   : > { %p282_p0 = scmp.lt.s32.totalorder %s13108_s25, 1  ;;  %p284_p1 = scmp.lt.s32.totalorder %s13104_s24, 1 }
 0x2e5   : > { %s15062_s25 = smov (!%p282_p0, %s13108_s25), 1  ;;  %s15064_s24 = smov (!%p284_p1, %s13104_s24), 1 }
 0x2e6   : > { %s11498_s10 = sshll.u32 %s15062_s25, 1 }
 0x2e7   : > { %s287_s6 = sadd.s32 %s11498_s10, %s15064_s24 }
 0x2e8   : > { %s11499_s29 = sshll.u32 %s287_s6, 3 }
 0x2e9   : > { %s289_s9 = scalar_lea.vmem %s15024_s4, %s11499_s29  ;;  %s297_s0 = scalar_lea.vmem %s15025_s5, %s11499_s29 }
 0x35f   : > { %v11230_v16 = vpop.xlane.xlu1 %11229 }
 0x360   : > { %11232 = vst.msk [vmem:[%s289_s9] sm:$0xff] %vm11231_vm5, %v11230_v16 }
 0x361   : > { %v11266_v6 = vpop.xlane.xlu0 %11265 }
 0x362   : > { %11267 = vst.msk [vmem:[%s297_s0] sm:$0xff] %vm11231_vm5, %v11266_v6 }
 0x363 PF: > { %p12869_p12 = scmp.ge.s32.totalorder %s13120_s28, 2  ;;  %s11337_s24 = sand.u32 1, %s13080_s18  }
 0x364   : > { %p15044_p3 = scmp.ne.s32.totalorder %s15039_s21, 0  ;;  %s11338_s25 = scalar_lea.sflag [#allocation4], %s11337_s24 }
 0x366   : > { %p12865_p8 = pnand %p12869_p12, %p15044_p3 }
 0x368   : > { %13075 = dma.done.wait (!%p12865_p8), %s11338_s25, 2048  }
 0x369   : > { %13077 = vsyncadd (!%p12865_p8), %s11338_s25, 4294965248  ;;  %s22_s28 = sadd.s32 1, %s13120_s28   ;;  %s15045_s24 = sld [smem:[#allocation8_spill]] }
 0x36a   : > { %p19_p10 = scmp.ge.s32.totalorder %s22_s28, 6   ;;  %s15046_s25 = sld [smem:[#allocation9_spill]] }
 0x36b   : > { %s15047_s26 = sld [smem:[#allocation10_spill]]  ;;  %s15048_s27 = sld [smem:[#allocation11_spill]] }
 0x36c   : > { %s15049_s18 = smov %s13084_s19  ;;  %s15050_s19 = smov %s13088_s20 }
 0x36d   : > { %s15051_s20 = smov %s13253_s17  ;;  %s15052_s21 = smov %s13096_s22 }
 0x36e   : > { %s15053_s22 = smov %s13100_s23  ;;  %s15054_s23 = smov %s13250_s16 }
 0x36f   :  { %21 = sbr.rel (!%p19_p10) target bundleno = 11 (0xb), region = 112 }
 0x376   :  { %11365 = vsyncpa [#allocation3], 1 }
 0x377   :  { %11367 = vsyncpa [#allocation3 + $0x1], 1 }
 0x378   :  { %11368 = vsyncpa [#allocation4], 1 }
 0x379   :  { %11370 = vsyncpa [#allocation4 + $0x1], 1 }

</bundles_post_ra>
